<compile_context>
chip_gen: v7x
topology: tpu7x:2x2x1
jax: 0.10.0
libtpu: 0.0.40
codegen_flags: <defaults>
</compile_context>

<pallas_src>
import jax
import jax.numpy as jnp
from jax import lax
from jax.experimental import pallas as pl
from jax.experimental.pallas import tpu as pltpu


def sepconv_skip_kernel(x_ref, top_ref, bot_ref, wdw_ref, wpw_ref, shift_ref, o_ref):
    # x_ref    : (1, TH, W, C)  current H-strip of the (unpadded) input, pre-ReLU
    # top_ref  : (1, 1, W, C)   row above the strip (index_map clamps at top edge)
    # bot_ref  : (1, 1, W, C)   row below the strip (index_map clamps at bottom edge)
    # wdw_ref  : (3, 3, C)      depthwise 3x3 weights
    # wpw_ref  : (C, C)         pointwise weights [c_in, c_out] with BN scale folded in
    # shift_ref: (1, C)         BN shift (eval-mode, folded)
    # o_ref    : (1, TH, W, C)
    TH, W, C = o_ref.shape[1], o_ref.shape[2], o_ref.shape[3]
    s = pl.program_id(1)
    ns = pl.num_programs(1)

    x_blk = x_ref[0]                                     # (TH, W, C), kept for the skip

    # Halo rows: zero them at the image edges (their index_maps clamp there).
    top = top_ref[0, 0] * (s > 0).astype(jnp.float32)    # (W, C)
    bot = bot_ref[0, 0] * (s < ns - 1).astype(jnp.float32)

    # Outer ReLU (the inner ReLU of SeparableConv2d is idempotent right after it).
    # xe rows: [row above strip, strip rows, row below strip]  -> (TH+2, W, C)
    xe = jnp.concatenate(
        [jnp.maximum(top, 0.0)[None],
         jnp.maximum(x_blk, 0.0),
         jnp.maximum(bot, 0.0)[None]], axis=0)

    # Width shifts via XLU rolls on the sublane axis (computed once, reused for
    # all 3 dy taps); zero-fill the wrapped column at the W edges.
    col = lax.broadcasted_iota(jnp.int32, xe.shape, 1)
    x_m1 = jnp.where(col == 0, 0.0, pltpu.roll(xe, 1, axis=1))        # xe[:, w-1, :]
    x_p1 = jnp.where(col == W - 1, 0.0, pltpu.roll(xe, W - 1, axis=1))  # xe[:, w+1, :]
    shifted = (x_m1, xe, x_p1)                           # indexed by dx (kernel column)

    # Depthwise 3x3, stride 1, padding 1 -- 9 multiply-accumulates on the VPU.
    wdw = wdw_ref[...]
    acc = shifted[0][0:TH] * wdw[0, 0]                   # first tap initializes acc
    for dy in range(3):
        for dx in range(3):
            if dy == 0 and dx == 0:
                continue
            acc = acc + shifted[dx][dy:dy + TH] * wdw[dy, dx]

    # Pointwise 1x1 conv == matmul over channels (MXU); BN scale already folded
    # into the weights, so only the shift add remains.
    y = jnp.dot(acc.reshape(TH * W, C), wpw_ref[...],
                preferred_element_type=jnp.float32)
    y = y + shift_ref[0]

    # Residual skip (pre-ReLU input of this strip).
    o_ref[0] = (y.reshape(TH, W, C) + x_blk).astype(o_ref.dtype)


def separable_conv_skip(x_nchw, w_dw, w_pw, gamma, beta, run_mean, run_var,
                        eps=1e-5, block_h=None):
    """x_nchw: (N, C, H, W); w_dw: (C, 1, 3, 3); w_pw: (C, C, 1, 1); BN params: (C,)."""
    N, C, H, W = x_nchw.shape

    # Pick an H-strip size (largest nice divisor of H).
    if block_h is None:
        block_h = H
        for cand in (256, 128, 64, 32, 16, 8):
            if cand <= H and H % cand == 0:
                block_h = cand
                break
    if H % block_h != 0:
        block_h = H
    th = block_h
    n_strips = H // th

    x = jnp.transpose(x_nchw, (0, 2, 3, 1)).astype(jnp.float32)          # NHWC, unpadded
    wdw = jnp.transpose(w_dw[:, 0, :, :], (1, 2, 0)).astype(jnp.float32)  # (3, 3, C)
    scale = (gamma / jnp.sqrt(run_var + eps)).astype(jnp.float32)
    shift = (beta - run_mean * scale).astype(jnp.float32)
    # Fold BN scale into the pointwise weights (tiny one-time XLA op, in f32).
    wpw = (jnp.transpose(w_pw[:, :, 0, 0], (1, 0)) * scale[None, :]).astype(jnp.float32)
    shift2d = shift.reshape(1, C)

    # VMEM budget: 2x double-buffered input strip + 2x output strip + temporaries.
    blk_bytes = th * W * C * 4
    vmem_limit = int(min(max(16 * blk_bytes + (1 << 20), 32 * 2**20), 48 * 2**20))

    grid_spec = pltpu.PrefetchScalarGridSpec(
        num_scalar_prefetch=0,
        grid=(N, n_strips),
        in_specs=[
            # strip body
            pl.BlockSpec((1, th, W, C), lambda n, s: (n, s, 0, 0)),
            # 1-row halos (H block size 1 => block index == row index), clamped at edges
            pl.BlockSpec((1, 1, W, C),
                         lambda n, s: (n, jnp.maximum(s * th - 1, 0), 0, 0)),
            pl.BlockSpec((1, 1, W, C),
                         lambda n, s: (n, jnp.minimum((s + 1) * th, H - 1), 0, 0)),
            # weights / BN shift (grid-invariant blocks, DMA'd once)
            pl.BlockSpec((3, 3, C), lambda n, s: (0, 0, 0)),
            pl.BlockSpec((C, C), lambda n, s: (0, 0)),
            pl.BlockSpec((1, C), lambda n, s: (0, 0)),
        ],
        out_specs=pl.BlockSpec((1, th, W, C), lambda n, s: (n, s, 0, 0)),
    )

    out_nhwc = pl.pallas_call(
        sepconv_skip_kernel,
        out_shape=jax.ShapeDtypeStruct((N, H, W, C), x.dtype),
        grid_spec=grid_spec,
        compiler_params=pltpu.CompilerParams(
            dimension_semantics=("parallel", "parallel"),
            vmem_limit_bytes=vmem_limit),
    )(x, x, x, wdw, wpw, shift2d)
    return jnp.transpose(out_nhwc, (0, 3, 1, 2))                          # back to NCHW


def reference_nchw(x, w_dw, w_pw, gamma, beta, run_mean, run_var, eps=1e-5):
    """Pure-JAX reference using lax.conv (mirrors the PyTorch graph)."""
    xr = jnp.maximum(x, 0.0)
    y = lax.conv_general_dilated(
        xr, w_dw, (1, 1), ((1, 1), (1, 1)),
        dimension_numbers=('NCHW', 'OIHW', 'NCHW'),
        feature_group_count=x.shape[1])
    y = lax.conv_general_dilated(
        y, w_pw, (1, 1), ((0, 0), (0, 0)),
        dimension_numbers=('NCHW', 'OIHW', 'NCHW'))
    scale = gamma / jnp.sqrt(run_var + eps)
    shift = beta - run_mean * scale
    y = y * scale[None, :, None, None] + shift[None, :, None, None]
    return y + x


if __name__ == "__main__":
    # Valid configuration of the PyTorch module requires in_filters == out_filters
    # (start_with_relu=True replaces the channel-changing conv with ReLU) and strides == 1.
    N, C, H, W = 2, 16, 16, 16
    key = jax.random.PRNGKey(0)
    k0, k1, k2, k3, k4, k5, k6 = jax.random.split(key, 7)

    x = jax.random.normal(k0, (N, C, H, W), jnp.float32)
    w_dw = jax.random.normal(k1, (C, 1, 3, 3), jnp.float32) * 0.2   # depthwise Conv2d weight
    w_pw = jax.random.normal(k2, (C, C, 1, 1), jnp.float32) * 0.2   # pointwise Conv2d weight
    gamma = 1.0 + 0.1 * jax.random.normal(k3, (C,), jnp.float32)    # BN params (eval mode)
    beta = 0.1 * jax.random.normal(k4, (C,), jnp.float32)
    run_mean = 0.1 * jax.random.normal(k5, (C,), jnp.float32)
    run_var = jnp.abs(jax.random.normal(k6, (C,), jnp.float32)) + 0.5
    # TODO(synk): BatchNorm is implemented in inference mode (running stats); training-mode
    # batch statistics would need a cross-sample reduction outside the per-strip grid.

    ref = reference_nchw(x, w_dw, w_pw, gamma, beta, run_mean, run_var)

    # block_h=8 -> 2 H-strips per image: exercises the halo path (top edge,
    # interior strip boundary, bottom edge) plus a multi-step pipelined grid.
    out = separable_conv_skip(x, w_dw, w_pw, gamma, beta, run_mean, run_var, block_h=8)
    out = jax.block_until_ready(out)
    assert out.shape == (N, C, H, W)
    assert jnp.allclose(out, ref, atol=1e-3, rtol=1e-3), "mismatch vs reference (block_h=8)"

    # Default strip choice (single strip at this toy H) must also match.
    out2 = jax.block_until_ready(
        separable_conv_skip(x, w_dw, w_pw, gamma, beta, run_mean, run_var))
    assert jnp.allclose(out2, ref, atol=1e-3, rtol=1e-3), "mismatch vs reference (default)"

    print("KERNEL_OK")
</pallas_src>

<mosaic_0001>
module attributes {stable_mosaic.version = 11 : i64} {
  func.func @sepconv_skip_kernel(%arg0: i32, %arg1: i32, %arg2: memref<1x8x16x16xf32, #tpu.memory_space<vmem>>, %arg3: memref<1x1x16x16xf32, #tpu.memory_space<vmem>>, %arg4: memref<1x1x16x16xf32, #tpu.memory_space<vmem>>, %arg5: memref<3x3x16xf32, #tpu.memory_space<vmem>>, %arg6: memref<16x16xf32, #tpu.memory_space<vmem>>, %arg7: memref<1x16xf32, #tpu.memory_space<vmem>>, %arg8: memref<1x8x16x16xf32, #tpu.memory_space<vmem>>) attributes {dimension_semantics = [#tpu.dimension_semantics<parallel>, #tpu.dimension_semantics<parallel>], iteration_bounds = array<i64: 2, 2>, scalar_prefetch = 0 : i64, scratch_operands = 0 : i64, tpu.core_type = #tpu.core_type<tc>, window_params = [{transform_indices = @transform_0, window_bounds = array<i64: 1, 8, 16, 16>}, {transform_indices = @transform_1, window_bounds = array<i64: 1, 1, 16, 16>}, {transform_indices = @transform_2, window_bounds = array<i64: 1, 1, 16, 16>}, {pipeline_mode = #tpu.pipeline_mode<synchronous>, transform_indices = @transform_3, window_bounds = array<i64: 3, 3, 16>}, {pipeline_mode = #tpu.pipeline_mode<synchronous>, transform_indices = @transform_4, window_bounds = array<i64: 16, 16>}, {pipeline_mode = #tpu.pipeline_mode<synchronous>, transform_indices = @transform_5, window_bounds = array<i64: 1, 16>}, {transform_indices = @transform_6, window_bounds = array<i64: 1, 8, 16, 16>}]} {
    %c0 = arith.constant 0 : index
    %c0_0 = arith.constant 0 : index
    %c0_1 = arith.constant 0 : index
    %c0_2 = arith.constant 0 : index
    %0 = vector.load %arg2[%c0, %c0_0, %c0_1, %c0_2] : memref<1x8x16x16xf32, #tpu.memory_space<vmem>>, vector<1x8x16x16xf32>
    %1 = vector.shape_cast %0 : vector<1x8x16x16xf32> to vector<8x16x16xf32>
    %c0_3 = arith.constant 0 : index
    %c0_4 = arith.constant 0 : index
    %c0_5 = arith.constant 0 : index
    %c0_6 = arith.constant 0 : index
    %2 = vector.load %arg3[%c0_3, %c0_4, %c0_5, %c0_6] : memref<1x1x16x16xf32, #tpu.memory_space<vmem>>, vector<1x1x16x16xf32>
    %3 = vector.shape_cast %2 : vector<1x1x16x16xf32> to vector<16x16xf32>
    %c0_i32 = arith.constant 0 : i32
    %4 = arith.cmpi sgt, %arg1, %c0_i32 : i32
    %5 = arith.extui %4 : i1 to i32
    %6 = arith.sitofp %5 : i32 to f32
    %7 = vector.broadcast %6 : f32 to vector<16x16xf32>
    %8 = arith.mulf %3, %7 : vector<16x16xf32>
    %c0_7 = arith.constant 0 : index
    %c0_8 = arith.constant 0 : index
    %c0_9 = arith.constant 0 : index
    %c0_10 = arith.constant 0 : index
    %9 = vector.load %arg4[%c0_7, %c0_8, %c0_9, %c0_10] : memref<1x1x16x16xf32, #tpu.memory_space<vmem>>, vector<1x1x16x16xf32>
    %10 = vector.shape_cast %9 : vector<1x1x16x16xf32> to vector<16x16xf32>
    %c1_i32 = arith.constant 1 : i32
    %11 = arith.cmpi slt, %arg1, %c1_i32 : i32
    %12 = arith.extui %11 : i1 to i32
    %13 = arith.sitofp %12 : i32 to f32
    %14 = vector.broadcast %13 : f32 to vector<16x16xf32>
    %15 = arith.mulf %10, %14 : vector<16x16xf32>
    %cst = arith.constant 0.000000e+00 : f32
    %16 = vector.broadcast %cst : f32 to vector<16x16xf32>
    %17 = arith.maximumf %8, %16 : vector<16x16xf32>
    %18 = vector.shape_cast %17 : vector<16x16xf32> to vector<1x16x16xf32>
    %cst_11 = arith.constant 0.000000e+00 : f32
    %19 = vector.broadcast %cst_11 : f32 to vector<8x16x16xf32>
    %20 = arith.maximumf %1, %19 : vector<8x16x16xf32>
    %cst_12 = arith.constant 0.000000e+00 : f32
    %21 = vector.broadcast %cst_12 : f32 to vector<16x16xf32>
    %22 = arith.maximumf %15, %21 : vector<16x16xf32>
    %23 = vector.shape_cast %22 : vector<16x16xf32> to vector<1x16x16xf32>
    %24 = tpu.concatenate %18, %20, %23 in 0 : vector<1x16x16xf32>, vector<8x16x16xf32>, vector<1x16x16xf32> -> vector<10x16x16xf32>
    %25 = tpu.iota {dimensions = array<i32: 1>} : vector<10x16x16xi32>
    %c0_i32_13 = arith.constant 0 : i32
    %26 = vector.broadcast %c0_i32_13 : i32 to vector<10x16x16xi32>
    %27 = arith.cmpi eq, %25, %26 : vector<10x16x16xi32>
    %c1_i32_14 = arith.constant 1 : i32
    %28 = tpu.dynamic_rotate %24 by %c1_i32_14 dim 1 : vector<10x16x16xf32>, i32 -> vector<10x16x16xf32>
    %cst_15 = arith.constant 0.000000e+00 : f32
    %29 = vector.broadcast %cst_15 : f32 to vector<10x16x16xf32>
    %30 = arith.select %27, %29, %28 : vector<10x16x16xi1>, vector<10x16x16xf32>
    %c15_i32 = arith.constant 15 : i32
    %31 = vector.broadcast %c15_i32 : i32 to vector<10x16x16xi32>
    %32 = arith.cmpi eq, %25, %31 : vector<10x16x16xi32>
    %c15_i32_16 = arith.constant 15 : i32
    %33 = tpu.dynamic_rotate %24 by %c15_i32_16 dim 1 : vector<10x16x16xf32>, i32 -> vector<10x16x16xf32>
    %cst_17 = arith.constant 0.000000e+00 : f32
    %34 = vector.broadcast %cst_17 : f32 to vector<10x16x16xf32>
    %35 = arith.select %32, %34, %33 : vector<10x16x16xi1>, vector<10x16x16xf32>
    %c0_18 = arith.constant 0 : index
    %c0_19 = arith.constant 0 : index
    %c0_20 = arith.constant 0 : index
    %36 = vector.load %arg5[%c0_18, %c0_19, %c0_20] : memref<3x3x16xf32, #tpu.memory_space<vmem>>, vector<3x3x16xf32>
    %37 = vector.extract_strided_slice %30 {offsets = [0, 0, 0], sizes = [8, 16, 16], strides = [1, 1, 1]} : vector<10x16x16xf32> to vector<8x16x16xf32>
    %38 = vector.extract_strided_slice %36 {offsets = [0, 0, 0], sizes = [1, 1, 16], strides = [1, 1, 1]} : vector<3x3x16xf32> to vector<1x1x16xf32>
    %39 = vector.shape_cast %38 : vector<1x1x16xf32> to vector<16xf32>
    %40 = vector.shape_cast %39 : vector<16xf32> to vector<1x1x16xf32>
    %41 = vector.broadcast %40 : vector<1x1x16xf32> to vector<8x16x16xf32>
    %42 = arith.mulf %37, %41 : vector<8x16x16xf32>
    %43 = vector.extract_strided_slice %24 {offsets = [0, 0, 0], sizes = [8, 16, 16], strides = [1, 1, 1]} : vector<10x16x16xf32> to vector<8x16x16xf32>
    %44 = vector.extract_strided_slice %36 {offsets = [0, 1, 0], sizes = [1, 1, 16], strides = [1, 1, 1]} : vector<3x3x16xf32> to vector<1x1x16xf32>
    %45 = vector.shape_cast %44 : vector<1x1x16xf32> to vector<16xf32>
    %46 = vector.shape_cast %45 : vector<16xf32> to vector<1x1x16xf32>
    %47 = vector.broadcast %46 : vector<1x1x16xf32> to vector<8x16x16xf32>
    %48 = arith.mulf %43, %47 : vector<8x16x16xf32>
    %49 = arith.addf %42, %48 : vector<8x16x16xf32>
    %50 = vector.extract_strided_slice %35 {offsets = [0, 0, 0], sizes = [8, 16, 16], strides = [1, 1, 1]} : vector<10x16x16xf32> to vector<8x16x16xf32>
    %51 = vector.extract_strided_slice %36 {offsets = [0, 2, 0], sizes = [1, 1, 16], strides = [1, 1, 1]} : vector<3x3x16xf32> to vector<1x1x16xf32>
    %52 = vector.shape_cast %51 : vector<1x1x16xf32> to vector<16xf32>
    %53 = vector.shape_cast %52 : vector<16xf32> to vector<1x1x16xf32>
    %54 = vector.broadcast %53 : vector<1x1x16xf32> to vector<8x16x16xf32>
    %55 = arith.mulf %50, %54 : vector<8x16x16xf32>
    %56 = arith.addf %49, %55 : vector<8x16x16xf32>
    %57 = vector.extract_strided_slice %30 {offsets = [1, 0, 0], sizes = [8, 16, 16], strides = [1, 1, 1]} : vector<10x16x16xf32> to vector<8x16x16xf32>
    %58 = vector.extract_strided_slice %36 {offsets = [1, 0, 0], sizes = [1, 1, 16], strides = [1, 1, 1]} : vector<3x3x16xf32> to vector<1x1x16xf32>
    %59 = vector.shape_cast %58 : vector<1x1x16xf32> to vector<16xf32>
    %60 = vector.shape_cast %59 : vector<16xf32> to vector<1x1x16xf32>
    %61 = vector.broadcast %60 : vector<1x1x16xf32> to vector<8x16x16xf32>
    %62 = arith.mulf %57, %61 : vector<8x16x16xf32>
    %63 = arith.addf %56, %62 : vector<8x16x16xf32>
    %64 = vector.extract_strided_slice %24 {offsets = [1, 0, 0], sizes = [8, 16, 16], strides = [1, 1, 1]} : vector<10x16x16xf32> to vector<8x16x16xf32>
    %65 = vector.extract_strided_slice %36 {offsets = [1, 1, 0], sizes = [1, 1, 16], strides = [1, 1, 1]} : vector<3x3x16xf32> to vector<1x1x16xf32>
    %66 = vector.shape_cast %65 : vector<1x1x16xf32> to vector<16xf32>
    %67 = vector.shape_cast %66 : vector<16xf32> to vector<1x1x16xf32>
    %68 = vector.broadcast %67 : vector<1x1x16xf32> to vector<8x16x16xf32>
    %69 = arith.mulf %64, %68 : vector<8x16x16xf32>
    %70 = arith.addf %63, %69 : vector<8x16x16xf32>
    %71 = vector.extract_strided_slice %35 {offsets = [1, 0, 0], sizes = [8, 16, 16], strides = [1, 1, 1]} : vector<10x16x16xf32> to vector<8x16x16xf32>
    %72 = vector.extract_strided_slice %36 {offsets = [1, 2, 0], sizes = [1, 1, 16], strides = [1, 1, 1]} : vector<3x3x16xf32> to vector<1x1x16xf32>
    %73 = vector.shape_cast %72 : vector<1x1x16xf32> to vector<16xf32>
    %74 = vector.shape_cast %73 : vector<16xf32> to vector<1x1x16xf32>
    %75 = vector.broadcast %74 : vector<1x1x16xf32> to vector<8x16x16xf32>
    %76 = arith.mulf %71, %75 : vector<8x16x16xf32>
    %77 = arith.addf %70, %76 : vector<8x16x16xf32>
    %78 = vector.extract_strided_slice %30 {offsets = [2, 0, 0], sizes = [8, 16, 16], strides = [1, 1, 1]} : vector<10x16x16xf32> to vector<8x16x16xf32>
    %79 = vector.extract_strided_slice %36 {offsets = [2, 0, 0], sizes = [1, 1, 16], strides = [1, 1, 1]} : vector<3x3x16xf32> to vector<1x1x16xf32>
    %80 = vector.shape_cast %79 : vector<1x1x16xf32> to vector<16xf32>
    %81 = vector.shape_cast %80 : vector<16xf32> to vector<1x1x16xf32>
    %82 = vector.broadcast %81 : vector<1x1x16xf32> to vector<8x16x16xf32>
    %83 = arith.mulf %78, %82 : vector<8x16x16xf32>
    %84 = arith.addf %77, %83 : vector<8x16x16xf32>
    %85 = vector.extract_strided_slice %24 {offsets = [2, 0, 0], sizes = [8, 16, 16], strides = [1, 1, 1]} : vector<10x16x16xf32> to vector<8x16x16xf32>
    %86 = vector.extract_strided_slice %36 {offsets = [2, 1, 0], sizes = [1, 1, 16], strides = [1, 1, 1]} : vector<3x3x16xf32> to vector<1x1x16xf32>
    %87 = vector.shape_cast %86 : vector<1x1x16xf32> to vector<16xf32>
    %88 = vector.shape_cast %87 : vector<16xf32> to vector<1x1x16xf32>
    %89 = vector.broadcast %88 : vector<1x1x16xf32> to vector<8x16x16xf32>
    %90 = arith.mulf %85, %89 : vector<8x16x16xf32>
    %91 = arith.addf %84, %90 : vector<8x16x16xf32>
    %92 = vector.extract_strided_slice %35 {offsets = [2, 0, 0], sizes = [8, 16, 16], strides = [1, 1, 1]} : vector<10x16x16xf32> to vector<8x16x16xf32>
    %93 = vector.extract_strided_slice %36 {offsets = [2, 2, 0], sizes = [1, 1, 16], strides = [1, 1, 1]} : vector<3x3x16xf32> to vector<1x1x16xf32>
    %94 = vector.shape_cast %93 : vector<1x1x16xf32> to vector<16xf32>
    %95 = vector.shape_cast %94 : vector<16xf32> to vector<1x1x16xf32>
    %96 = vector.broadcast %95 : vector<1x1x16xf32> to vector<8x16x16xf32>
    %97 = arith.mulf %92, %96 : vector<8x16x16xf32>
    %98 = arith.addf %91, %97 : vector<8x16x16xf32>
    %99 = vector.shape_cast %98 : vector<8x16x16xf32> to vector<128x16xf32>
    %c0_21 = arith.constant 0 : index
    %c0_22 = arith.constant 0 : index
    %100 = vector.load %arg6[%c0_21, %c0_22] : memref<16x16xf32, #tpu.memory_space<vmem>>, vector<16x16xf32>
    %cst_23 = arith.constant dense<0.000000e+00> : vector<128x16xf32>
    %101 = tpu.matmul %99, %100, %cst_23 {dimension_numbers = #tpu.dot_dimension_numbers<[1], [0], [0], [1], [0, 0, 1, 1], [], []>} : vector<128x16xf32>, vector<16x16xf32>, vector<128x16xf32> -> vector<128x16xf32>
    %c0_24 = arith.constant 0 : index
    %c0_25 = arith.constant 0 : index
    %102 = vector.load %arg7[%c0_24, %c0_25] : memref<1x16xf32, #tpu.memory_space<vmem>>, vector<1x16xf32>
    %103 = vector.shape_cast %102 : vector<1x16xf32> to vector<16xf32>
    %104 = vector.shape_cast %103 : vector<16xf32> to vector<1x16xf32>
    %105 = vector.broadcast %104 : vector<1x16xf32> to vector<128x16xf32>
    %106 = arith.addf %101, %105 : vector<128x16xf32>
    %107 = vector.shape_cast %106 : vector<128x16xf32> to vector<8x16x16xf32>
    %108 = arith.addf %107, %1 : vector<8x16x16xf32>
    %c0_26 = arith.constant 0 : index
    %c0_27 = arith.constant 0 : index
    %c0_28 = arith.constant 0 : index
    %c0_29 = arith.constant 0 : index
    %109 = vector.load %arg8[%c0_26, %c0_27, %c0_28, %c0_29] : memref<1x8x16x16xf32, #tpu.memory_space<vmem>>, vector<1x8x16x16xf32>
    %110 = vector.shape_cast %109 : vector<1x8x16x16xf32> to vector<8x16x16xf32>
    %111 = vector.shape_cast %108 : vector<8x16x16xf32> to vector<1x8x16x16xf32>
    tpu.vector_store %arg8[%c0_26, %c0_27, %c0_28, %c0_29], %111 {strides = array<i32>} : memref<1x8x16x16xf32, #tpu.memory_space<vmem>>, vector<1x8x16x16xf32>,
    return
  }
  func.func @transform_0(%arg0: i32, %arg1: i32) -> (i32, i32, i32, i32) {
    %c0_i32 = arith.constant 0 : i32
    %c0_i32_0 = arith.constant 0 : i32
    %c0_i32_1 = arith.constant 0 : i32
    return %arg0, %arg1, %c0_i32, %c0_i32_0 : i32, i32, i32, i32
  }
  func.func @transform_1(%arg0: i32, %arg1: i32) -> (i32, i32, i32, i32) {
    %c8_i32 = arith.constant 8 : i32
    %0 = arith.muli %arg1, %c8_i32 : i32
    %c1_i32 = arith.constant 1 : i32
    %1 = arith.subi %0, %c1_i32 : i32
    %c0_i32 = arith.constant 0 : i32
    %2 = arith.maxsi %1, %c0_i32 : i32
    %c0_i32_0 = arith.constant 0 : i32
    %c0_i32_1 = arith.constant 0 : i32
    %c0_i32_2 = arith.constant 0 : i32
    return %arg0, %2, %c0_i32_0, %c0_i32_1 : i32, i32, i32, i32
  }
  func.func @transform_2(%arg0: i32, %arg1: i32) -> (i32, i32, i32, i32) {
    %c1_i32 = arith.constant 1 : i32
    %0 = arith.addi %arg1, %c1_i32 : i32
    %c8_i32 = arith.constant 8 : i32
    %1 = arith.muli %0, %c8_i32 : i32
    %c15_i32 = arith.constant 15 : i32
    %2 = arith.minsi %1, %c15_i32 : i32
    %c0_i32 = arith.constant 0 : i32
    %c0_i32_0 = arith.constant 0 : i32
    %c0_i32_1 = arith.constant 0 : i32
    return %arg0, %2, %c0_i32, %c0_i32_0 : i32, i32, i32, i32
  }
  func.func @transform_3(%arg0: i32, %arg1: i32) -> (i32, i32, i32) {
    %c0_i32 = arith.constant 0 : i32
    %c0_i32_0 = arith.constant 0 : i32
    %c0_i32_1 = arith.constant 0 : i32
    %c0_i32_2 = arith.constant 0 : i32
    return %c0_i32, %c0_i32_0, %c0_i32_1 : i32, i32, i32
  }
  func.func @transform_4(%arg0: i32, %arg1: i32) -> (i32, i32) {
    %c0_i32 = arith.constant 0 : i32
    %c0_i32_0 = arith.constant 0 : i32
    %c0_i32_1 = arith.constant 0 : i32
    return %c0_i32, %c0_i32_0 : i32, i32
  }
  func.func @transform_5(%arg0: i32, %arg1: i32) -> (i32, i32) {
    %c0_i32 = arith.constant 0 : i32
    %c0_i32_0 = arith.constant 0 : i32
    %c0_i32_1 = arith.constant 0 : i32
    return %c0_i32, %c0_i32_0 : i32, i32
  }
  func.func @transform_6(%arg0: i32, %arg1: i32) -> (i32, i32, i32, i32) {
    %c0_i32 = arith.constant 0 : i32
    %c0_i32_0 = arith.constant 0 : i32
    %c0_i32_1 = arith.constant 0 : i32
    return %arg0, %arg1, %c0_i32, %c0_i32_0 : i32, i32, i32, i32
  }
}

</mosaic_0001>

<bundles_post_ra>
// kernel: tpu_custom_call.1
= control target key start
LH: loop header
LB: loop body
LE: loop exit
PB: predicated region body
PF: predicated region fallthrough
CT: control target
= control target key end

     0   :  { %s3324_s0 = inlined_call_operand.hbm [shape: f32[2,16,16,16], index: 0, kind: input, shape index: {}]   ;;  %s3325_s1 = inlined_call_operand.hbm [shape: f32[2,16,16,16], index: 1, kind: input, shape index: {}]   ;;  %s3326_s2 = inlined_call_operand.hbm [shape: f32[2,16,16,16], index: 2, kind: input, shape index: {}]   ;;  %s3327_s3 = inlined_call_operand.hbm [shape: f32[3,3,16], index: 3, kind: input, shape index: {}]   ;;  %s3328_s4 = inlined_call_operand.hbm [shape: f32[16,16], index: 4, kind: input, shape index: {}]   ;;  %s3329_s5 = inlined_call_operand.vmem [shape: f32[1,16], index: 5, kind: input, shape index: {}]   ;;  %s3330_s6 = inlined_call_operand.hbm [shape: f32[2,16,16,16], index: 6, kind: output, shape index: {}]  }
   0x1   :  { %3402 = sst [smem:[#allocation50_spill]] %s3324_s0 }
   0x2   :  { %3403 = sst [smem:[#allocation51_spill]] %s3325_s1 }
   0x3   :  { %3404 = sst [smem:[#allocation52_spill]] %s3326_s2 }
   0x4   :  { %3405 = sst [smem:[#allocation53_spill]] %s3327_s3 }
   0x5   :  { %3406 = sst [smem:[#allocation54_spill]] %s3328_s4 }
   0x6   :  { %3407 = sst [smem:[#allocation55_spill]] %s3329_s5 }
   0x7   :  { %3408 = sst [smem:[#allocation56_spill]] %s3330_s6 }
   0x8   :  { %11 = vsyncpa [#allocation3], 0 }
   0x9   :  { %13 = vsyncpa [#allocation3 + $0x1], 0 }
   0xa   :  { %14 = vsyncpa [#allocation6], 0 }
   0xb   :  { %16 = vsyncpa [#allocation6 + $0x1], 0 }
   0xc   :  { %17 = vsyncpa [#allocation9], 0 }
   0xd   :  { %18 = vsyncpa [#allocation4], 0 }
   0xe   :  { %20 = vsyncpa [#allocation4 + $0x1], 0  ;;  %s1976_s21 = smov 0   ;;  %s1978_s22 = smov 0  }
   0xf   :  { %s1980_s23 = smov 0   ;;  %s1982_s24 = smov 0  }
  0x10   :  { %s1984_s25 = smov 0   ;;  %s1986_s26 = smov 0  }
  0x11   :  { %s1988_s27 = smov 0   ;;  %s1990_s28 = smov 0  }
  0x12   :  { %s1992_s29 = smov 0   ;;  %s1994_s30 = smov 0  }
  0x13   :  { %s1996_s7 = smov 0   ;;  %s1998_s8 = smov 0  }
  0x14   :  { %s2000_s9 = smov 0   ;;  %s2002_s10 = smov 0  }
  0x15 LB: > { %3409 = sst [smem:[#allocation17_spill]] %s1875_s21  ;;  %s2047_s11 = sadd.s32 4294967295, %s1927_s10   ;;  %s1927_s10 = sphi %s2002_s10, %s26_s10   ;;  %s1923_s9 = sphi %s2000_s9, %s3555_s9   ;;  %s1919_s8 = sphi %s1998_s8, %s3554_s8   ;;  %s1915_s7 = sphi %s1996_s7, %s3553_s7   ;;  %s1911_s30 = sphi %s1994_s30, %s3552_s30   ;;  %s1907_s29 = sphi %s1992_s29, %s3562_s29   ;;  %s1903_s28 = sphi %s1990_s28, %s3561_s28   ;;  %s1899_s27 = sphi %s1988_s27, %s3560_s27   ;;  %s1895_s26 = sphi %s1986_s26, %s3559_s26   ;;  %s1891_s25 = sphi %s1984_s25, %s3558_s25   ;;  %s1887_s24 = sphi %s1982_s24, %s3550_s24   ;;  %s1883_s23 = sphi %s1980_s23, %s3557_s23   ;;  %s1879_s22 = sphi %s1978_s22, %s3549_s22   ;;  %s1875_s21 = sphi %s1976_s21, %s3548_s21  }
  0x16   : > { %3410 = sst [smem:[#allocation18_spill]] %s1879_s22  ;;  %p1347_p0 = scmp.ge.s32.totalorder %s1927_s10, 1 }
  0x17   : > { %3411 = sst [smem:[#allocation19_spill]] %s1883_s23  ;;  %p3332_p1 = scmp.eq.s32.totalorder %s2047_s11, 0 }
  0x18   : > { %3412 = sst [smem:[#allocation20_spill]] %s1891_s25  ;;  %p234_p3 = scmp.lt.s32.totalorder %s1927_s10, 5 }
  0x19   : > { %3413 = sst [smem:[#allocation21_spill]] %s1911_s30  ;;  %s1929_s13 = smov [#allocation8]  }
  0x1a   : > { %3414 = sst [smem:[#allocation22_spill]] %s1915_s7  ;;  %p2053_p4 = pnand %p1347_p0, %p234_p3 }
  0x1b   : > { %3415 = sst [smem:[#allocation23_spill]] %s1919_s8  ;;  %s246_s14 = sshll.u32 %s1929_s13, 4  ;;  %s247_s14 = int_to_ptr.vmem [resolvable:$true] %s246_s14 }
  0x1c   : > { %3416 = sst [smem:[#allocation24_spill]] %s1923_s9  ;;  %p1474_p5 = pneg %p2053_p4 }
  0x1d   : > { %s3417_s12 = scalar_select %p2053_p4, 1, 0 }
  0x1e   : > { %p2061_p6 = pnand %p1474_p5, %p3332_p1  ;;  %s3420_s3 = sld [smem:[#allocation53_spill]] }
  0x1f   : > { %3418 = sst [smem:[#allocation25_spill]] %s3417_s12 }
  0x20   : > { %p3347_p8 = pneg %p2061_p6 }
  0x24   : > { %s1623_s18 = scalar_lea.hbm %s3420_s3, 192 }
  0x25   : > { %p1624_p7 = scmp.ne.s32.totalorder %s3420_s3, %s1623_s18  ;;  %p1630_p11 = scmp.lt.u32.totalorder %s1623_s18, %s3420_s3 }
  0x27   : > { %p1626_p9 = pnand %p3347_p8, %p1624_p7 }
  0x29   : > { %p1627_p10 = pneg %p1626_p9 }
  0x2b   : > { %p1632_p12 = pnand %p1630_p11, %p1627_p10 }
  0x2d   : > { %1635 = shalt.err (!%p1632_p12)
}
  0x2e   : > { %s1636_s16 = scalar_lea.vmem %s247_s14, 192  ;;  %p1644_p5 = scmp.lt.s32.totalorder %s247_s14, %s247_s14 }
  0x2f   : > { %p1637_p13 = scmp.ne.s32.totalorder %s247_s14, %s1636_s16  ;;  %p1645_p2 = scmp.lt.s32.totalorder %s1636_s16, %s1636_s16 }
  0x31   : > { %p1639_p0 = pnand %p1637_p13, %p3347_p8  ;;  %p1646_p1 = por %p1645_p2, %p1644_p5 }
  0x33   : > { %p1640_p3 = pneg %p1639_p0 }
  0x35   : > { %p1647_p4 = pnand %p1646_p1, %p1640_p3 }
  0x37   : > { %1650 = shalt.err (!%p1647_p4)
}
  0x38   : > { %s1930_s17 = smov 64   ;;  %s1931_s6 = smov 4  }
  0x39   : > { %1477 = dma.hbm_to_vmem [thread:$0]  (!%p2061_p6), %s3420_s3, 192, %s247_s14, [#allocation9], %s1930_s17, %s1930_s17, %s1931_s6  }
  0x3a   : > { %s35_s20 = sadd.s32 1, %s1919_s8  ;;  %s38_s13 = sadd.s32 1, %s1923_s9 }
  0x3b   : > { %p36_p1 = scmp.ge.s32.totalorder %s35_s20, 2  ;;  %p3346_p2 = scmp.eq.s32.totalorder %s1927_s10, 0 }
  0x3c   : > { %s1341_s16 = sshll.u32 %s1919_s8, 3  ;;  %s83_s7 = sadd.s32 1, %s1895_s26 }
  0x3d   : > { %s3564_s20 = smov (%p36_p1, %s35_s20), 0  ;;  %s3566_s13 = smov (!%p36_p1, %s38_s13), %s1923_s9 }
  0x3e   : > { %3421 = sst [smem:[#allocation26_spill]] %s3564_s20  ;;  %s43_s5 = ssub.s32 %s1919_s8, %s3564_s20 }
  0x3f   : > { %s1342_s30 = sadd.s32 4294967295, %s1341_s16  ;;  %p40_p4 = scmp.ge.s32.totalorder %s3566_s13, 2 }
  0x40   : > { %p72_p7 = scmp.gt.s32.totalorder %s1342_s30, 0  ;;  %s1343_s14 = sshll.u32 %s3564_s20, 3 }
  0x41   : > { %p90_p9 = scmp.ne.s32.totalorder %s1895_s26, %s1891_s25  ;;  %s3568_s13 = smov (%p40_p4, %s3566_s13), 0 }
  0x42   : > { %3422 = sst [smem:[#allocation27_spill]] %s3568_s13  ;;  %s3570_s30 = smov (!%p72_p7, %s1342_s30), 0 }
  0x43   : > { %s2104_s17 = ssub.s32 %s1923_s9, %s3568_s13  ;;  %s1344_s6 = sadd.s32 4294967295, %s1343_s14 }
  0x44   : > { %3423 = sst [smem:[#allocation28_spill]] %s2104_s17  ;;  %s2107_s18 = sor.u32 %s43_s5, %s2104_s17 }
  0x45   : > { %p76_p10 = scmp.gt.s32.totalorder %s1344_s6, 0  ;;  %p2112_p12 = por %p90_p9, %p3346_p2 }
  0x46   : > { %p96_p13 = scmp.ne.s32.totalorder %s1891_s25, %s1887_s24  ;;  %s2118_s3 = sadd.s32 8, %s1341_s16 }
  0x47   : > { %s3572_s6 = smov (!%p76_p10, %s1344_s6), 0  ;;  %p3425_p3 = scmp.eq.s32.totalorder %s2047_s11, 0 }
  0x48   : > { %s79_s13 = ssub.s32 %s3570_s30, %s3572_s6  ;;  %s2128_s12 = sadd.s32 8, %s1343_s14 }
  0x49   : > { %s80_s5 = sor.u32 %s79_s13, %s2104_s17  ;;  %p2124_p5 = por %p96_p13, %p3425_p3 }
  0x4a   : > { %p81_p1 = scmp.eq.s32.totalorder %s80_s5, 0  ;;  %p3345_p7 = scmp.lt.s32.totalorder %s1927_s10, 4 }
  0x4b   : > { %s3426_s20 = scalar_select %p2124_p5, 1, 0 }
  0x4c   : > { %s2132_s2 = scalar_select %p81_p1, %s1895_s26, %s83_s7  }
  0x4d   : > { %3427 = sst [smem:[#allocation29_spill]] %s3426_s20  ;;  %s2136_s24 = sshll.u32 %s1923_s9, 5 }
  0x4e   : > { %s300_s16 = sand.u32 1, %s1927_s10   ;;  %s302_s13 = sand.u32 1, %s1895_s26  }
  0x4f   : > { %s1356_s6 = sshll.u32 %s302_s13, 4  ;;  %s1359_s25 = sshll.u32 %s3570_s30, 1 }
  0x50   : > { %s314_s17 = sadd.s32 %s1359_s25, %s2136_s24  ;;  %s304_s20 = scalar_lea.vmem [#allocation5], %s1356_s6 }
  0x51   : > { %s1361_s21 = sshll.u32 %s314_s17, 7  ;;  %s317_s5 = sshll.u32 %s304_s20, 4  ;;  %s2146_s5 = int_to_ptr.vmem [resolvable:$true] %s317_s5 }
  0x52   : > { %s3428_s1 = sld [smem:[#allocation51_spill]]  ;;  %p2152_p9 = pnand %p3345_p7, %p2112_p12 }
  0x53   : > { %s1932_s25 = smov [#allocation10]  }
  0x54   : > { %s259_s30 = sshll.u32 %s1932_s25, 4  ;;  %p1653_p13 = pneg %p2152_p9  ;;  %s2156_s30 = int_to_ptr.vmem [resolvable:$true] %s259_s30 }
  0x58   : > { %s2144_s14 = scalar_lea.hbm %s3428_s1, %s1361_s21  ;;  %s2158_s21 = scalar_lea.sflag [#allocation6], %s300_s16 }
  0x59   : > { %s1651_s22 = scalar_lea.hbm %s2144_s14, 256  ;;  %s1656_s17 = scalar_lea.hbm %s3428_s1, 8192 }
  0x5a   : > { %p1652_p10 = scmp.ne.s32.totalorder %s2144_s14, %s1651_s22  ;;  %p1657_p12 = scmp.lt.u32.totalorder %s2144_s14, %s3428_s1 }
  0x5b   : > { %p1658_p4 = scmp.lt.u32.totalorder %s1656_s17, %s1651_s22  ;;  %p1660_p7 = scmp.lt.u32.totalorder %s1651_s22, %s2144_s14 }
  0x5c   : > { %p1654_p3 = pnand %p1653_p13, %p1652_p10 }
  0x5d   : > { %p1659_p0 = por %p1658_p4, %p1657_p12 }
  0x5e   : > { %p1655_p1 = pneg %p1654_p3 }
  0x5f   : > { %p1661_p2 = por %p1660_p7, %p1659_p0 }
  0x61   : > { %p1662_p11 = pnand %p1661_p2, %p1655_p1 }
  0x63   : > { %1665 = shalt.err (!%p1662_p11)
}
  0x64   : > { %s1666_s16 = scalar_lea.vmem %s2146_s5, 256  ;;  %s1933_s6 = smov [#allocation5]  }
  0x65   : > { %p1667_p10 = scmp.ne.s32.totalorder %s2146_s5, %s1666_s16  ;;  %s1671_s25 = sshll.u32 %s1933_s6, 4  ;;  %s1672_s25 = int_to_ptr.vmem [resolvable:$false] %s1671_s25 }
  0x66   : > { %s1673_s23 = scalar_lea.vmem %s1672_s25, 512  ;;  %p1674_p5 = scmp.lt.s32.totalorder %s2146_s5, %s1672_s25 }
  0x67   : > { %p1669_p3 = pnand %p1667_p10, %p1653_p13  ;;  %p1675_p4 = scmp.lt.s32.totalorder %s1673_s23, %s1666_s16 }
  0x69   : > { %p1670_p8 = pneg %p1669_p3  ;;  %p1676_p12 = por %p1675_p4, %p1674_p5 }
  0x6b   : > { %p1677_p0 = pnand %p1676_p12, %p1670_p8 }
  0x6d   : > { %1680 = shalt.err (!%p1677_p0)
}
  0x6e   : > { %s3349_s22 = smov 128   ;;  %s3351_s20 = smov 8  }
  0x6f   : > { %1487 = dma.hbm_to_vmem [thread:$0]  (!%p2152_p9), %s2144_s14, 256, %s2146_s5, %s2158_s21, %s3349_s22, %s3349_s22, %s3351_s20  }
  0x70   : > { %s3430_s4 = sld [smem:[#allocation54_spill]]  ;;  %p3431_p2 = pneg %p2061_p6 }
  0x76   : > { %s1681_s13 = scalar_lea.hbm %s3430_s4, 256 }
  0x77   : > { %p1682_p8 = scmp.ne.s32.totalorder %s3430_s4, %s1681_s13  ;;  %p1688_p7 = scmp.lt.u32.totalorder %s1681_s13, %s3430_s4 }
  0x79   : > { %p1684_p11 = pnand %p1682_p8, %p3431_p2 }
  0x7b   : > { %p1685_p5 = pneg %p1684_p11 }
  0x7d   : > { %p1690_p13 = pnand %p1688_p7, %p1685_p5 }
  0x7f   : > { %1693 = shalt.err (!%p1690_p13)
}
  0x80   : > { %s1694_s5 = scalar_lea.vmem %s2156_s30, 256  ;;  %p3432_p1 = pmov %p3431_p2 }
  0x81   : > { %p1695_p9 = scmp.ne.s32.totalorder %s2156_s30, %s1694_s5  ;;  %p1702_p4 = scmp.lt.s32.totalorder %s2156_s30, %s2156_s30 }
  0x82   : > { %p1703_p12 = scmp.lt.s32.totalorder %s1694_s5, %s1694_s5 }
  0x83   : > { %p1697_p10 = pnand %p1695_p9, %p3432_p1 }
  0x84   : > { %p1704_p0 = por %p1703_p12, %p1702_p4 }
  0x85   : > { %p1698_p3 = pneg %p1697_p10 }
  0x87   : > { %p1705_p8 = pnand %p1704_p0, %p1698_p3 }
  0x89   : > { %1708 = shalt.err (!%p1705_p8)
}
  0x8a   : > { %1480 = dma.hbm_to_vmem [thread:$0]  (!%p2061_p6), %s3430_s4, 256, %s2156_s30, [#allocation9], %s3349_s22, %s3349_s22, %s3351_s20  }
  0x8b   : > { %s1340_s15 = sadd.s32 4294967294, %s1927_s10   ;;  %s47_s17 = sadd.s32 1, %s1907_s29 }
  0x8c   : > { %p54_p2 = scmp.ne.s32.totalorder %s1907_s29, %s1903_s28  ;;  %p3433_p11 = scmp.eq.s32.totalorder %s2107_s18, 0 }
  0x8d   : > { %p3435_p5 = scmp.eq.s32.totalorder %s1927_s10, 0  ;;  %p60_p13 = scmp.ne.s32.totalorder %s1903_s28, %s1899_s27 }
  0x8e   : > { %s2224_s19 = scalar_select %p3433_p11, %s1907_s29, %s47_s17  }
  0x8f   : > { %p2228_p7 = por %p3435_p5, %p54_p2  ;;  %p3437_p9 = scmp.eq.s32.totalorder %s2047_s11, 3 }
  0x90   : > { %3434 = sst [smem:[#allocation30_spill]] %s2224_s19  ;;  %p227_p6 = scmp.eq.s32.totalorder %s1340_s15, 3 }
  0x91   : > { %p2236_p1 = por %p3437_p9, %p54_p2  ;;  %p3439_p10 = scmp.eq.s32.totalorder %s2047_s11, 0 }
  0x92   : > { %s276_s18 = sand.u32 1, %s1907_s29   ;;  %p2247_p4 = por %p227_p6, %p60_p13 }
  0x93   : > { %s3438_s16 = scalar_select %p2236_p1, 1, 0 }
  0x94   : > { %p2242_p3 = por %p3439_p10, %p60_p13  ;;  %s1351_s25 = sshll.u32 %s276_s18, 7 }
  0x95   : > { %s3441_s6 = scalar_select %p2247_p4, 1, 0 }
  0x96   : > { %s1402_s23 = sshll.u32 %s1919_s8, 4  ;;  %s280_s7 = scalar_lea.vmem [#allocation2], %s1351_s25 }
  0x97   : > { %s287_s5 = sadd.s32 %s1402_s23, %s2136_s24  ;;  %s290_s17 = sshll.u32 %s280_s7, 4  ;;  %s2258_s17 = int_to_ptr.vmem [resolvable:$true] %s290_s17 }
  0x98   : > { %s1355_s14 = sshll.u32 %s287_s5, 7  ;;  %s3442_s0 = sld [smem:[#allocation50_spill]] }
  0x99   : > { %p3443_p12 = scmp.lt.s32.totalorder %s1927_s10, 4  ;;  %s2268_s25 = scalar_lea.sflag [#allocation3], %s276_s18 }
  0x9b   : > { %p2264_p0 = pnand %p3443_p12, %p2228_p7 }
  0x9d   : > { %p1711_p2 = pneg %p2264_p0 }
  0x9e   : > { %s2256_s15 = scalar_lea.hbm %s3442_s0, %s1355_s14  ;;  %s1714_s13 = scalar_lea.hbm %s3442_s0, 8192 }
  0x9f   : > { %s1709_s23 = scalar_lea.hbm %s2256_s15, 2048  ;;  %p1715_p7 = scmp.lt.u32.totalorder %s2256_s15, %s3442_s0 }
  0xa0   : > { %p1710_p8 = scmp.ne.s32.totalorder %s2256_s15, %s1709_s23  ;;  %p1716_p13 = scmp.lt.u32.totalorder %s1714_s13, %s1709_s23 }
  0xa1   : > { %p1718_p6 = scmp.lt.u32.totalorder %s1709_s23, %s2256_s15 }
  0xa2   : > { %p1712_p11 = pnand %p1711_p2, %p1710_p8  ;;  %p1717_p9 = por %p1716_p13, %p1715_p7 }
  0xa4   : > { %p1713_p5 = pneg %p1712_p11  ;;  %p1719_p10 = por %p1718_p6, %p1717_p9 }
  0xa6   : > { %p1720_p12 = pnand %p1719_p10, %p1713_p5 }
  0xa8   : > { %1723 = shalt.err (!%p1720_p12)
}
  0xa9   : > { %s1724_s18 = scalar_lea.vmem %s2258_s17, 2048  ;;  %s1936_s7 = smov [#allocation2]  }
  0xaa   : > { %p1725_p8 = scmp.ne.s32.totalorder %s2258_s17, %s1724_s18  ;;  %s1729_s22 = sshll.u32 %s1936_s7, 4  ;;  %s1730_s22 = int_to_ptr.vmem [resolvable:$false] %s1729_s22 }
  0xab   : > { %s1731_s20 = scalar_lea.vmem %s1730_s22, 4096  ;;  %p1732_p1 = scmp.lt.s32.totalorder %s2258_s17, %s1730_s22 }
  0xac   : > { %p1727_p11 = pnand %p1725_p8, %p1711_p2  ;;  %p1733_p7 = scmp.lt.s32.totalorder %s1731_s20, %s1724_s18 }
  0xae   : > { %p1728_p4 = pneg %p1727_p11  ;;  %p1734_p13 = por %p1733_p7, %p1732_p1 }
  0xb0   : > { %p1735_p9 = pnand %p1734_p13, %p1728_p4 }
  0xb2   : > { %1738 = shalt.err (!%p1735_p9)
}
  0xb3   : > { %s3445_s23 = smov 8   ;;  %s3446_s13 = smov 128  }
  0xb4   : > { %s3447_s5 = sld [smem:[#allocation19_spill]]  ;;  %s3448_s14 = sld [smem:[#allocation18_spill]] }
  0xb5   : > { %s3449_s7 = sld [smem:[#allocation17_spill]]  ;;  %s3450_s18 = sld [smem:[#allocation28_spill]] }
  0xb6   : > { %1484 = dma.hbm_to_vmem [thread:$0]  (!%p2264_p0), %s2256_s15, 2048, %s2258_s17, %s2268_s25, %s3446_s13, %s3446_s13, %s3445_s23  }
  0xb7   : > { %p3451_p1 = scmp.lt.s32.totalorder %s2118_s3, 15  ;;  %p3452_p4 = scmp.lt.s32.totalorder %s2128_s12, 15 }
  0xb8   : > { %p3453_p6 = scmp.eq.s32.totalorder %s1927_s10, 0  ;;  %p3455_p8 = scmp.eq.s32.totalorder %s2047_s11, 0 }
  0xb9   : > { %s3574_s3 = smov (!%p3451_p1, %s2118_s3), 15  ;;  %s3576_s12 = smov (!%p3452_p4, %s2128_s12), 15 }
  0xba   : > { %s119_s1 = sadd.s32 1, %s3447_s5  ;;  %p126_p2 = scmp.ne.s32.totalorder %s3447_s5, %s3448_s14 }
  0xbb   : > { %s115_s22 = ssub.s32 %s3574_s3, %s3576_s12  ;;  %p132_p5 = scmp.ne.s32.totalorder %s3448_s14, %s3449_s7 }
  0xbc   : > { %s116_s20 = sor.u32 %s115_s22, %s3450_s18  ;;  %p2313_p10 = por %p126_p2, %p3453_p6 }
  0xbd   : > { %p117_p12 = scmp.eq.s32.totalorder %s116_s20, 0  ;;  %p2319_p11 = por %p132_p5, %p3455_p8 }
  0xbe   : > { %s329_s15 = sand.u32 1, %s3447_s5   ;;  %s1364_s25 = sshll.u32 %s3574_s3, 1 }
  0xbf   : > { %s3456_s17 = scalar_select %p2319_p11, 1, 0 }
  0xc0   : > { %s3578_s5 = smov (!%p117_p12, %s3447_s5), %s119_s1  ;;  %s1362_s12 = sshll.u32 %s329_s15, 4 }
  0xc1   : > { %s341_s4 = sadd.s32 %s1364_s25, %s2136_s24  ;;  %s3457_s22 = sld [smem:[#allocation52_spill]] }
  0xc2   : > { %s1366_s14 = sshll.u32 %s341_s4, 7  ;;  %s331_s20 = scalar_lea.vmem [#allocation7], %s1362_s12 }
  0xc3   : > { %s344_s8 = sshll.u32 %s331_s20, 4  ;;  %p3459_p0 = scmp.lt.s32.totalorder %s1927_s10, 4  ;;  %s2333_s8 = int_to_ptr.vmem [resolvable:$true] %s344_s8 }
  0xc5   : > { %p2339_p7 = pnand %p3459_p0, %p2313_p10 }
  0xc7   : > { %s3458_s19 = smov %s3457_s22  ;;  %s2331_s9 = scalar_lea.hbm %s3457_s22, %s1366_s14 }
  0xc8   : > { %s1739_s4 = scalar_lea.hbm %s2331_s9, 256  ;;  %p1741_p9 = pneg %p2339_p7 }
  0xc9   : > { %p1740_p13 = scmp.ne.s32.totalorder %s2331_s9, %s1739_s4  ;;  %s1744_s15 = scalar_lea.hbm %s3458_s19, 8192 }
  0xca   : > { %p1745_p2 = scmp.lt.u32.totalorder %s2331_s9, %s3458_s19  ;;  %p1746_p5 = scmp.lt.u32.totalorder %s1744_s15, %s1739_s4 }
  0xcb   : > { %p1742_p1 = pnand %p1741_p9, %p1740_p13  ;;  %p1748_p10 = scmp.lt.u32.totalorder %s1739_s4, %s2331_s9 }
  0xcc   : > { %p1747_p6 = por %p1746_p5, %p1745_p2 }
  0xcd   : > { %p1743_p4 = pneg %p1742_p1 }
  0xce   : > { %p1749_p12 = por %p1748_p10, %p1747_p6 }
  0xd0   : > { %p1750_p8 = pnand %p1749_p12, %p1743_p4 }
  0xd2   : > { %1753 = shalt.err (!%p1750_p8)
}
  0xd3   : > { %s1754_s12 = scalar_lea.vmem %s2333_s8, 256  ;;  %s1937_s14 = smov [#allocation7]  }
  0xd4   : > { %p1755_p0 = scmp.ne.s32.totalorder %s2333_s8, %s1754_s12  ;;  %s1759_s7 = sshll.u32 %s1937_s14, 4  ;;  %s1760_s7 = int_to_ptr.vmem [resolvable:$false] %s1759_s7 }
  0xd5   : > { %s1761_s18 = scalar_lea.vmem %s1760_s7, 512  ;;  %p1762_p11 = scmp.lt.s32.totalorder %s2333_s8, %s1760_s7 }
  0xd6   : > { %p1757_p13 = pnand %p1755_p0, %p1741_p9  ;;  %p1763_p2 = scmp.lt.s32.totalorder %s1761_s18, %s1754_s12 }
  0xd8   : > { %p1758_p1 = pneg %p1757_p13  ;;  %p1764_p5 = por %p1763_p2, %p1762_p11 }
  0xda   : > { %p1765_p6 = pnand %p1764_p5, %p1758_p1 }
  0xdc   : > { %1768 = shalt.err (!%p1765_p6)
}
  0xdd   : > { %1490 = dma.hbm_to_vmem [thread:$0]  (!%p2339_p7), %s2331_s9, 256, %s2333_s8, %s2158_s21, %s3446_s13, %s3446_s13, %s3445_s23  }
  0xde   : > { %s3461_s22 = sld [smem:[#allocation25_spill]] }
  0xe4   : > { %p3462_p9 = scmp.ne.s32.totalorder %s3461_s22, 0 }
  0xe6   : > { %356 = sbr.rel (%p3462_p9) target bundleno = 617 (0x269), region = 44 }
  0xed   : > { %s2375_s20 = sand.u32 1, %s1903_s28  }
  0xee   : > { %s1368_s4 = sshll.u32 %s2375_s20, 7  ;;  %s359_s24 = scalar_lea.sflag [#allocation3], %s2375_s20 }
  0xef   : > { %s2381_s3 = scalar_lea.vmem [#allocation2], %s1368_s4 }
  0xf0   : > { %1854 = dma.done.wait (%p2242_p3), %s359_s24, 2048  }
  0xf1   : > { %1856 = vsyncadd (%p2242_p3), %s359_s24, 4294965248  ;;  %s3463_s8 = sld [smem:[#allocation20_spill]]  ;;  %s3464_s9 = sld [smem:[#allocation29_spill]] }
  0xf2   : > { %s367_s21 = sand.u32 1, %s2047_s11  }
  0xf3   : > { %s368_s1 = scalar_lea.sflag [#allocation6], %s367_s21 }
  0xf7   : > { %s369_s23 = sand.u32 1, %s3463_s8   ;;  %p3465_p11 = scmp.ne.s32.totalorder %s3464_s9, 0 }
  0xf8   : > { %s2389_s13 = sshll.u32 %s369_s23, 4 }
  0xf9   : > { %s371_s15 = scalar_lea.vmem [#allocation5], %s2389_s13 }
  0xfa   : > { %1858 = dma.done.wait (%p3465_p11), %s368_s1, 256  }
  0xfb   : > { %1860 = vsyncadd (%p3465_p11), %s368_s1, 4294967040  ;;  %s3466_s0 = sld [smem:[#allocation18_spill]]  ;;  %p3467_p3 = scmp.ne.s32.totalorder %s3456_s17, 0 }
 0x101   : > { %s378_s25 = sand.u32 1, %s3466_s0  }
 0x102   : > { %s2397_s30 = sshll.u32 %s378_s25, 4 }
 0x103   : > { %s380_s12 = scalar_lea.vmem [#allocation7], %s2397_s30 }
 0x104   : > { %1862 = dma.done.wait (%p3467_p3), %s368_s1, 256  }
 0x105   : > { %1864 = vsyncadd (%p3467_p3), %s368_s1, 4294967040  ;;  %p3468_p7 = scmp.eq.s32.totalorder %s2047_s11, 0 }
 0x107   : > { %1866 = dma.done.wait (%p3468_p7), [#allocation9], 448   ;;  %p3469_p4 = pmov %p3468_p7 }
 0x108   : > { %s3470_s14 = sld [smem:[#allocation21_spill]]  ;;  %v489_v0 = vlaneseq  ;;  %v929_v2 = vld [vmem:[#allocation10] sm:$0xff]  ;;  %v930_v3 = vld [vmem:[#allocation10 + $0x8] sm:$0xff]  ;;  %v2419_v8 = vld [vmem:[%s2381_s3 + $0x40] sm:$0xff]  ;;  %vm938_vm3 = vcmask 130048   ;;  %s3529_s8 = sld [smem:[#allocation55_spill]] }
 0x109   : > { %1868 = vsyncadd (%p3469_p4), [#allocation9], 4294966848  ;;  %v443_v4 = vld [vmem:[%s2381_s3 + $0x30] sm:$0xff]  ;;  %v1452_v6 = vpack.c.bf16 %v930_v3, %v929_v2  ;;  %v444_v7 = vld [vmem:[%s2381_s3 + $0x38] sm:$0xff]  ;;  %3471 = vst [vmem:[#allocation31_spill] sm:$0xff] %v2419_v8  ;;  %v2444_v17 = vmax.f32 %v2419_v8, 0.0 }
 0x10a   : > { %v2408_v1 = vshrl.u32 %v489_v0, 7  ;;  %v2422_v9 = vld [vmem:[%s2381_s3 + $0x48] sm:$0xff]  ;;  %v2424_v10 = vmax.f32 %v443_v4, 0.0  ;;  %v2433_v13 = vld [vmem:[%s2381_s3 + $0x50] sm:$0xff]  ;;  %v2436_v14 = vld [vmem:[%s2381_s3 + $0x58] sm:$0xff]  ;;  %v2441_v16 = vmax.f32 %v444_v7, 0.0 }
 0x10b   : > { %3472 = vst [vmem:[#allocation32_spill] sm:$0xff] %v2422_v9  ;;  %3473 = vst [vmem:[#allocation33_spill] sm:$0xff] %v2433_v13  ;;  %v2439_v15 = vld [vmem:[%s2381_s3 + $0x60] sm:$0xff]  ;;  %v2447_v18 = vmax.f32 %v2422_v9, 0.0  ;;  %1456 = vmatprep.subr.bf16.mxu1 %v1452_v6  ;;  %1453 = vmatprep.subr.bf16.mxu0 %v1452_v6  ;;  %v2450_v19 = vld [vmem:[%s2381_s3 + $0x68] sm:$0xff]  ;;  %v2453_v20 = vmax.f32 %v2433_v13, 0.0 }
 0x10c   : > { %vm492_vm0 = vcmp.eq.s32.totalorder %v2408_v1, 0  ;;  %vm514_vm1 = vcmp.lt.s32.totalorder %v2408_v1, 1  ;;  %v2415_v5 = vsub.s32 0, %v2408_v1  ;;  %v2427_v11 = vsub.s32 1, %v2408_v1  ;;  %3474 = vst [vmem:[#allocation34_spill] sm:$0xff] %v2436_v14  ;;  %3475 = vst [vmem:[#allocation35_spill] sm:$0xff] %v2439_v15  ;;  %1457 = vmatpush3.bf16.msra.mxu1 %v1452_v6  ;;  %1455 = vmatpush3.bf16.msra.mxu0 %v1452_v6 }
 0x10d   : > { %v2430_v12 = vsub.s32 2, %v2408_v1  ;;  %3476 = vst [vmem:[#allocation36_spill] sm:$0xff] %v2441_v16  ;;  %3477 = vst [vmem:[#allocation37_spill] sm:$0xff] %v2444_v17  ;;  %v2456_v21 = vmax.f32 %v2436_v14, 0.0  ;;  %v2459_v22 = vmax.f32 %v2439_v15, 0.0  ;;  %v3369_v23 = vrot.slane %v2424_v10, 7 }
 0x10e   : > { %p455_p10 = scmp.gt.s32.totalorder %s3470_s14, 0  ;;  %3478 = vst [vmem:[#allocation38_spill] sm:$0xff] %v2450_v19  ;;  %v2463_v24 = vmax.f32 %v2450_v19, 0.0  ;;  %v3359_v25 = vrot.slane %v2444_v17, 7  ;;  %v3370_v26 = vrot.slane %v2441_v16, 7  ;;  %v3360_v27 = vrot.slane %v2447_v18, 7 }
 0x10f   : > { %p463_p12 = scmp.lt.s32.totalorder %s3470_s14, 1  ;;  %v3367_v28 = vrot.slane %v2453_v20, 7  ;;  %v3357_v29 = vrot.slane %v2459_v22, 7  ;;  %v3368_v30 = vrot.slane %v2456_v21, 7  ;;  %v3366_v31 = vrot.slane %v2424_v10, 1  ;;  %s3176_s9 = scalar_lea.vmem [#allocation11], %s1368_s4 }
 0x110   : > { %s2475_s11 = scalar_select %p455_p10, 1, 0  ;;  %v3358_v32 = vrot.slane %v2463_v24, 7  ;;  %v529_v33 = vsel %vm514_vm1, %v3370_v26, %v3369_v23  ;;  %v530_v34 = vsel %vm514_vm1, %v3360_v27, %v3359_v25  ;;  %v3364_v35 = vrot.slane %v2444_v17, 1  ;;  %v618_v36 = vld [vmem:[#allocation8] sm:$0x7] }
 0x111   : > { %v531_v37 = vsel %vm514_vm1, %v3368_v30, %v3367_v28  ;;  %v2499_v38 = vsel %vm492_vm0, 0.0, %v529_v33  ;;  %v3362_v39 = vrot.slane %v2453_v20, 1  ;;  %vm577_vm2 = vcmp.lt.s32.totalorder %v2408_v1, 7  ;;  %v619_v40 = vld [vmem:[#allocation8 + $0x4] sm:$0x7]  ;;  %s3538_s4 = sld [smem:[#allocation22_spill]] }
 0x112   : > { %v2505_v41 = vsel %vm492_vm0, 0.0, %v530_v34  ;;  %v547_v42 = vsel %vm492_vm0, 0.0, %v531_v37  ;;  %v3365_v43 = vrot.slane %v2441_v16, 1  ;;  %v3363_v44 = vrot.slane %v2447_v18, 1  ;;  %s2513_s17 = scalar_select %p463_p12, 1, 0 }
 0x113   : > { %3479 = vst [vmem:[#allocation39_spill] sm:$0xff] %v2505_v41  ;;  %v532_v45 = vsel %vm514_vm1, %v3358_v32, %v3357_v29  ;;  %v3361_v46 = vrot.slane %v2456_v21, 1  ;;  %v2523_v47 = vrot.slane %v618_v36, %v2415_v5  ;;  %v2526_v48 = vrot.slane %v618_v36, %v2427_v11  ;;  %s457_s7 = scvt.s32.f32 %s2475_s11  ;;  %v620_v61 = vld [vmem:[#allocation8 + $0x8] sm:$0x7]  ;;  %s1405_s21 = sshll.u32 %s3470_s14, 4 }
 0x114   : > { %v2535_v49 = vsel %vm577_vm2, %v3366_v31, %v3365_v43  ;;  %v2543_v50 = vsel %vm577_vm2, %v3364_v35, %v3363_v44  ;;  %v2546_v51 = vrot.slane %v618_v36, %v2430_v12  ;;  %v2549_v52 = vrot.slane %v619_v40, %v2415_v5  ;;  %s465_s18 = scvt.s32.f32 %s2513_s17  ;;  %v454_v29 = vld [vmem:[%s371_s15 + $0x8] sm:$0xff]  ;;  %v2636_v35 = vld [vmem:[%s2381_s3 + $0x20] sm:$0xff]  ;;  %s3543_s30 = sld [smem:[#allocation56_spill]] }
 0x115   : > { %3480 = vst [vmem:[#allocation40_spill] sm:$0xff] %v2543_v50  ;;  %v584_v53 = vsel %vm577_vm2, %v3362_v39, %v3361_v46  ;;  %v633_v54 = vmul.f32 %v2523_v47, %v2499_v38  ;;  %v635_v55 = vmul.f32 %v2523_v47, %v2505_v41  ;;  %v637_v56 = vmul.f32 %v2523_v47, %v547_v42  ;;  %v2633_v44 = vld [vmem:[%s2381_s3 + $0x18] sm:$0xff]  ;;  %s1165_s11 = scalar_lea.sflag [#allocation4], %s2375_s20  ;;  %p3545_p0 = scmp.ne.s32.totalorder %s3438_s16, 0 }
 0x116   : > { %v2564_v57 = vsel %vm492_vm0, 0.0, %v532_v45  ;;  %v653_v58 = vmul.f32 %v2526_v48, %v2424_v10  ;;  %v655_v59 = vmul.f32 %v2526_v48, %v2444_v17  ;;  %v657_v60 = vmul.f32 %v2526_v48, %v2453_v20  ;;  %3485 = vst [vmem:[#allocation45_spill] sm:$0xff] %v2633_v44  ;;  %3486 = vst [vmem:[#allocation46_spill] sm:$0xff] %v2636_v35 }
 0x117   : > { %v689_v62 = vmul.f32 %v2546_v51, %v2535_v49  ;;  %v691_v63 = vmul.f32 %v2546_v51, %v2543_v50  ;;  %v693_v0 = vmul.f32 %v2546_v51, %v584_v53  ;;  %v458_v2 = vstv %s457_s7  ;;  %s1394_s23 = sshll.u32 %s3538_s4, 5  ;;  %s1938_s7 = smov [#allocation11]  }
 0x118   : > { %v669_v3 = vadd.f32 %v653_v58, %v633_v54  ;;  %v671_v4 = vadd.f32 %v655_v59, %v635_v55  ;;  %v673_v6 = vadd.f32 %v657_v60, %v637_v56  ;;  %v725_v7 = vmul.f32 %v2549_v52, %v2505_v41  ;;  %v453_v58 = vld [vmem:[%s371_s15] sm:$0xff]  ;;  %s1178_s13 = sadd.s32 %s1405_s21, %s1394_s23  ;;  %s1181_s15 = sshll.u32 %s3176_s9, 4  ;;  %s3241_s15 = int_to_ptr.vmem [resolvable:$true] %s1181_s15 }
 0x119   : > { %v727_v33 = vmul.f32 %v2549_v52, %v547_v42  ;;  %v729_v34 = vmul.f32 %v2549_v52, %v2564_v57  ;;  %v2584_v36 = vrot.slane %v619_v40, %v2427_v11  ;;  %v2587_v37 = vrot.slane %v619_v40, %v2430_v12  ;;  %s1395_s1 = sshll.u32 %s1178_s13, 7  ;;  %s1769_s17 = scalar_lea.vmem %s3241_s15, 2048 }
 0x11a   : > { %v705_v45 = vadd.f32 %v689_v62, %v669_v3  ;;  %v707_v54 = vadd.f32 %v691_v63, %v671_v4  ;;  %v709_v55 = vadd.f32 %v693_v0, %v673_v6  ;;  %v2590_v56 = vrot.slane %v620_v61, %v2415_v5  ;;  %v2615_v3 = vld [vmem:[%s2381_s3] sm:$0xff]  ;;  %v2618_v4 = vld [vmem:[%s2381_s3 + $0x8] sm:$0xff]  ;;  %s3239_s14 = scalar_lea.hbm %s3543_s30, %s1395_s1  ;;  %p1770_p8 = scmp.ne.s32.totalorder %s3241_s15, %s1769_s17 }
 0x11b   : > { %v761_v59 = vmul.f32 %v2584_v36, %v2444_v17  ;;  %v2597_v60 = vrot.slane %v620_v61, %v2427_v11  ;;  %v2602_v40 = vadd.s32 8, %v2408_v1  ;;  %v2604_v62 = vstv %s465_s18  ;;  %3482 = vst [vmem:[#allocation42_spill] sm:$0xff] %v2615_v3  ;;  %3483 = vst [vmem:[#allocation43_spill] sm:$0xff] %v2618_v4  ;;  %s1773_s18 = sshll.u32 %s1938_s7, 4  ;;  %s1774_s18 = int_to_ptr.vmem [resolvable:$false] %s1773_s18 }
 0x11c   : > { %3481 = vst [vmem:[#allocation41_spill] sm:$0xff] %v2604_v62  ;;  %v741_v63 = vadd.f32 %v725_v7, %v705_v45  ;;  %v763_v5 = vmul.f32 %v2584_v36, %v2453_v20  ;;  %v2610_v0 = vmul.f32 %v2584_v36, %v2459_v22  ;;  %v797_v11 = vmul.f32 %v2587_v37, %v2543_v50  ;;  %v2626_v45 = vld [vmem:[%s2381_s3 + $0x10] sm:$0xff]  ;;  %p1771_p13 = pnand %p1770_p8, %p3545_p0  ;;  %s1775_s22 = scalar_lea.vmem %s1774_s18, 4096 }
 0x11d   : > { %v743_v6 = vadd.f32 %v727_v33, %v707_v54  ;;  %v2620_v32 = vadd.f32 %v729_v34, %v709_v55  ;;  %v2623_v7 = vrot.slane %v620_v61, %v2430_v12  ;;  %3484 = vst [vmem:[#allocation44_spill] sm:$0xff] %v2626_v45  ;;  %v459_v25 = vmul.f32 %v458_v2, %v453_v58  ;;  %v2639_v33 = vld [vmem:[%s2381_s3 + $0x28] sm:$0xff]  ;;  %p1776_p2 = scmp.lt.s32.totalorder %s3241_s15, %s1774_s18  ;;  %p1777_p5 = scmp.lt.s32.totalorder %s1775_s22, %s1769_s17 }
 0x11e   : > { %v777_v27 = vadd.f32 %v761_v59, %v741_v63  ;;  %v2629_v46 = vmul.f32 %v2587_v37, %v584_v53  ;;  %v833_v39 = vmul.f32 %v2590_v56, %v547_v42  ;;  %3487 = vst [vmem:[#allocation47_spill] sm:$0xff] %v2639_v33  ;;  %v460_v34 = vmul.f32 %v458_v2, %v454_v29  ;;  %p1772_p1 = pneg %p1771_p13 }
 0x11f   : > { %v869_v12 = vmul.f32 %v2597_v60, %v2453_v20  ;;  %v2643_v61 = vmax.f32 %v459_v25, 0.0  ;;  %v2646_v54 = vmax.f32 %v2615_v3, 0.0  ;;  %v2649_v55 = vmax.f32 %v2618_v4, 0.0  ;;  %p1778_p6 = por %p1777_p5, %p1776_p2 }
 0x120   : > { %v813_v58 = vadd.f32 %v797_v11, %v777_v27  ;;  %v905_v42 = vmul.f32 %v2623_v7, %v584_v53  ;;  %v2652_v59 = vmax.f32 %v460_v34, 0.0  ;;  %v2655_v63 = vmax.f32 %v2626_v45, 0.0 }
 0x121   : > { %v2658_v29 = vmax.f32 %v2633_v44, 0.0  ;;  %v2661_v25 = vmax.f32 %v2636_v35, 0.0  ;;  %v2664_v2 = vmax.f32 %v2639_v33, 0.0  ;;  %v3371_v43 = vrot.slane %v2643_v61, 7  ;;  %p1779_p9 = pnand %p1778_p6, %p1772_p1 }
 0x122   : > { %v849_v31 = vadd.f32 %v833_v39, %v813_v58  ;;  %v3374_v27 = vrot.slane %v2646_v54, 7  ;;  %v3372_v11 = vrot.slane %v2652_v59, 7  ;;  %v3375_v28 = vrot.slane %v2649_v55, 7 }
 0x123   : > { %v3376_v30 = vrot.slane %v2658_v29, 7  ;;  %v3379_v23 = vrot.slane %v2664_v2, 7  ;;  %v779_v58 = vadd.f32 %v763_v5, %v743_v6  ;;  %v3380_v33 = vrot.slane %v2649_v55, 1 }
 0x124   : > { %v885_v26 = vadd.f32 %v869_v12, %v849_v31  ;;  %v525_v39 = vsel %vm514_vm1, %v3372_v11, %v3371_v43  ;;  %v526_v34 = vsel %vm514_vm1, %v3375_v28, %v3374_v27  ;;  %v3488_v31 = vrot.slane %v2655_v63, 7 }
 0x125   : > { %v3489_v43 = vrot.slane %v2661_v25, 7  ;;  %v535_v53 = vsel %vm492_vm0, 0.0, %v525_v39  ;;  %v537_v27 = vsel %vm492_vm0, 0.0, %v526_v34  ;;  %v3382_v15 = vrot.slane %v2658_v29, 1 }
 0x126   : > { %v527_v12 = vsel %vm514_vm1, %v3376_v30, %v3488_v31  ;;  %v921_v35 = vadd.f32 %v905_v42, %v885_v26  ;;  %v3383_v31 = vrot.slane %v2655_v63, 1  ;;  %v3381_v30 = vrot.slane %v2652_v59, 1 }
 0x127   : > { %v528_v11 = vsel %vm514_vm1, %v3379_v23, %v3489_v43  ;;  %v539_v28 = vsel %vm492_vm0, 0.0, %v527_v12  ;;  %vm556_vm4 = vcmp.eq.s32.totalorder %v2602_v40, 15  ;;  %v625_v43 = vmul.f32 %v2523_v47, %v535_v53 }
 0x128   : > { %1440 = vmatprep.mubr.msk.f32.mxu1 %vm938_vm3, %v921_v35  ;;  %v2714_v26 = vsel %vm492_vm0, 0.0, %v528_v11  ;;  %v627_v5 = vmul.f32 %v2523_v47, %v537_v27  ;;  %v629_v6 = vmul.f32 %v2523_v47, %v539_v28  ;;  %v3490_v42 = vrot.slane %v2643_v61, 1 }
 0x129   : > { %v3491_v35 = vrot.slane %v2646_v54, 1  ;;  %v580_v53 = vsel %vm577_vm2, %v3383_v31, %v3382_v15  ;;  %v645_v39 = vmul.f32 %v2526_v48, %v2643_v61  ;;  %v647_v12 = vmul.f32 %v2526_v48, %v2646_v54 }
 0x12a   : > { %v578_v34 = vsel %vm577_vm2, %v3490_v42, %v3381_v30  ;;  %v649_v42 = vmul.f32 %v2526_v48, %v2655_v63  ;;  %v685_v15 = vmul.f32 %v2546_v51, %v580_v53  ;;  %v717_v31 = vmul.f32 %v2549_v52, %v537_v27 }
 0x12b   : > { %v579_v11 = vsel %vm577_vm2, %v3491_v35, %v3380_v33  ;;  %v681_v23 = vmul.f32 %v2546_v51, %v578_v34  ;;  %v2747_v33 = vmul.f32 %v2523_v47, %v2564_v57  ;;  %v661_v30 = vadd.f32 %v645_v39, %v625_v43 }
 0x12c   : > { %v683_v35 = vmul.f32 %v2546_v51, %v579_v11  ;;  %v2753_v19 = vadd.f32 %v2610_v0, %v2620_v32  ;;  %v663_v45 = vadd.f32 %v647_v12, %v627_v5  ;;  %v665_v44 = vadd.f32 %v649_v42, %v629_v6 }
 0x12d   : > { %v719_v13 = vmul.f32 %v2549_v52, %v539_v28  ;;  %v2757_v34 = vadd.f32 %v2629_v46, %v779_v58  ;;  %v697_v14 = vadd.f32 %v681_v23, %v661_v30  ;;  %v721_v3 = vmul.f32 %v2549_v52, %v2714_v26 }
 0x12e   : > { %v753_v43 = vmul.f32 %v2584_v36, %v2646_v54  ;;  %v699_v39 = vadd.f32 %v683_v35, %v663_v45  ;;  %v701_v27 = vadd.f32 %v685_v15, %v665_v44  ;;  %v755_v32 = vmul.f32 %v2584_v36, %v2655_v63 }
 0x12f   : > { %v757_v0 = vmul.f32 %v2584_v36, %v2661_v25  ;;  %v733_v5 = vadd.f32 %v717_v31, %v697_v14  ;;  %v789_v6 = vmul.f32 %v2587_v37, %v579_v11  ;;  %v791_v46 = vmul.f32 %v2587_v37, %v580_v53 }
 0x130   : > { %v825_v23 = vmul.f32 %v2590_v56, %v539_v28  ;;  %v735_v30 = vadd.f32 %v719_v13, %v699_v39  ;;  %v861_v58 = vmul.f32 %v2597_v60, %v2655_v63  ;;  %v3492_v45 = vrot.slane %v2441_v16, 7 }
 0x131   : > { %v3493_v15 = vrot.slane %v2424_v10, 7  ;;  %v3494_v14 = vrot.slane %v2456_v21, 7  ;;  %v3495_v31 = vrot.slane %v2453_v20, 7  ;;  %v769_v28 = vadd.f32 %v753_v43, %v733_v5 }
 0x132   : > { %v3496_v13 = vrot.slane %v2424_v10, 1  ;;  %v3497_v12 = vrot.slane %v2441_v16, 1  ;;  %v3498_v35 = vrot.slane %v2444_v17, 1  ;;  %v3499_v39 = vrot.slane %v2447_v18, 1 }
 0x133   : > { %v2778_v44 = vsel %vm514_vm1, %v3493_v15, %v3492_v45  ;;  %v521_v11 = vsel %vm514_vm1, %v3495_v31, %v3494_v14  ;;  %v3500_v15 = vrot.slane %v2453_v20, 1  ;;  %v3501_v4 = vrot.slane %v2456_v21, 1 }
 0x134   : > { %v592_v42 = vsel %vm577_vm2, %v3497_v12, %v3496_v13  ;;  %v593_v45 = vsel %vm577_vm2, %v3499_v39, %v3498_v35  ;;  %v737_v5 = vadd.f32 %v721_v3, %v701_v27  ;;  %v771_v14 = vadd.f32 %v755_v32, %v735_v30 }
 0x135   : > { %v594_v43 = vsel %vm577_vm2, %v3501_v4, %v3500_v15  ;;  %v3502_v31 = vrot.slane %v2447_v18, 7  ;;  %v3503_v13 = vrot.slane %v2444_v17, 7  ;;  %v2814_v35 = vsel %vm556_vm4, 0.0, %v592_v42 }
 0x136   : > { %3504 = vst [vmem:[#allocation48_spill] sm:$0xff] %v2814_v35  ;;  %v805_v20 = vadd.f32 %v789_v6, %v769_v28  ;;  %v611_v39 = vsel %vm556_vm4, 0.0, %v594_v43  ;;  %v634_v3 = vmul.f32 %v2523_v47, %v2778_v44  ;;  %v638_v4 = vmul.f32 %v2523_v47, %v521_v11 }
 0x137   : > { %v2810_v12 = vsel %vm514_vm1, %v3503_v13, %v3502_v31  ;;  %v2823_v27 = vsel %vm556_vm4, 0.0, %v593_v45  ;;  %v654_v32 = vmul.f32 %v2526_v48, %v2441_v16  ;;  %v658_v30 = vmul.f32 %v2526_v48, %v2456_v21 }
 0x138   : > { %3505 = vst [vmem:[#allocation49_spill] sm:$0xff] %v2823_v27  ;;  %v690_v6 = vmul.f32 %v2546_v51, %v2814_v35  ;;  %v2833_v28 = vmul.f32 %v2523_v47, %v2714_v26  ;;  %v841_v42 = vadd.f32 %v825_v23, %v805_v20  ;;  %v897_v15 = vmul.f32 %v2623_v7, %v580_v53 }
 0x139   : > { %v694_v43 = vmul.f32 %v2546_v51, %v611_v39  ;;  %v2837_v45 = vadd.f32 %v757_v0, %v737_v5  ;;  %v670_v31 = vadd.f32 %v654_v32, %v634_v3  ;;  %v674_v13 = vadd.f32 %v658_v30, %v638_v4 }
 0x13a   : > { %v726_v8 = vmul.f32 %v2549_v52, %v2810_v12  ;;  %v2841_v9 = vadd.f32 %v791_v46, %v771_v14  ;;  %v877_v50 = vadd.f32 %v861_v58, %v841_v42  ;;  %v2845_v17 = vmul.f32 %v2546_v51, %v2823_v27 }
 0x13b   : > { %v2848_v23 = vmul.f32 %v2549_v52, %v521_v11  ;;  %v706_v53 = vadd.f32 %v690_v6, %v670_v31  ;;  %v2850_v20 = vadd.f32 %v694_v43, %v674_v13  ;;  %v762_v0 = vmul.f32 %v2584_v36, %v2447_v18 }
 0x13c   : > { %v798_v5 = vmul.f32 %v2587_v37, %v2823_v27  ;;  %v913_v3 = vadd.f32 %v897_v15, %v877_v50  ;;  %v834_v46 = vmul.f32 %v2590_v56, %v521_v11  ;;  %v3506_v58 = vrot.slane %v2652_v59, 7 }
 0x13d   : > { %v3507_v14 = vrot.slane %v2643_v61, 7  ;;  %v3508_v32 = vrot.slane %v2658_v29, 7  ;;  %v3509_v30 = vrot.slane %v2655_v63, 7  ;;  %v742_v42 = vadd.f32 %v726_v8, %v706_v53 }
 0x13e   : > { %v3510_v50 = vrot.slane %v2643_v61, 1  ;;  %v3511_v11 = vrot.slane %v2652_v59, 1  ;;  %v3512_v43 = vrot.slane %v2646_v54, 1  ;;  %v3513_v31 = vrot.slane %v2649_v55, 1  ;;  %1428 = vmatprep.mubr.msk.f32.mxu0 %vm938_vm3, %v913_v3 }
 0x13f   : > { %v515_v4 = vsel %vm514_vm1, %v3507_v14, %v3506_v58  ;;  %v2869_v6 = vsel %vm514_vm1, %v3509_v30, %v3508_v32  ;;  %v3514_v58 = vrot.slane %v2655_v63, 1  ;;  %v3515_v14 = vrot.slane %v2658_v29, 1 }
 0x140   : > { %v588_v15 = vsel %vm577_vm2, %v3511_v11, %v3510_v50  ;;  %v589_v13 = vsel %vm577_vm2, %v3513_v31, %v3512_v43  ;;  %v3516_v61 = vrot.slane %v2649_v55, 7  ;;  %v3517_v53 = vrot.slane %v2646_v54, 7 }
 0x141   : > { %v590_v8 = vsel %vm577_vm2, %v3515_v14, %v3514_v58  ;;  %v599_v30 = vsel %vm556_vm4, 0.0, %v588_v15  ;;  %v626_v50 = vmul.f32 %v2523_v47, %v515_v4  ;;  %v778_v11 = vadd.f32 %v762_v0, %v742_v42 }
 0x142   : > { %v516_v32 = vsel %vm514_vm1, %v3517_v53, %v3516_v61  ;;  %v2900_v63 = vsel %vm556_vm4, 0.0, %v590_v8  ;;  %v601_v3 = vsel %vm556_vm4, 0.0, %v589_v13  ;;  %v630_v43 = vmul.f32 %v2523_v47, %v2869_v6 }
 0x143   : > { %v646_v54 = vmul.f32 %v2526_v48, %v2652_v59  ;;  %v2910_v31 = vmul.f32 %v2587_v37, %v611_v39  ;;  %v650_v15 = vmul.f32 %v2526_v48, %v2658_v29  ;;  %v682_v58 = vmul.f32 %v2546_v51, %v599_v30 }
 0x144   : > { %v686_v0 = vmul.f32 %v2546_v51, %v2900_v63  ;;  %v814_v4 = vadd.f32 %v798_v5, %v778_v11  ;;  %v870_v42 = vmul.f32 %v2597_v60, %v2456_v21  ;;  %v718_v14 = vmul.f32 %v2549_v52, %v516_v32 }
 0x145   : > { %v662_v13 = vadd.f32 %v646_v54, %v626_v50  ;;  %v906_v59 = vmul.f32 %v2623_v7, %v611_v39  ;;  %v2922_v8 = vmul.f32 %v2523_v47, %v516_v32  ;;  %v666_v61 = vadd.f32 %v650_v15, %v630_v43 }
 0x146   : > { %v2925_v53 = vmul.f32 %v2546_v51, %v601_v3  ;;  %v850_v30 = vadd.f32 %v834_v46, %v814_v4  ;;  %v754_v5 = vmul.f32 %v2584_v36, %v2649_v55  ;;  %v790_v11 = vmul.f32 %v2587_v37, %v601_v3 }
 0x147   : > { %v698_v27 = vadd.f32 %v682_v58, %v662_v13  ;;  %v2930_v41 = vadd.f32 %v686_v0, %v666_v61  ;;  %v826_v50 = vmul.f32 %v2590_v56, %v2869_v6  ;;  %v564_v39 = vrot.slane %v2459_v22, 1 }
 0x148   : > { %v574_v32 = vrot.slane %v2463_v24, 1  ;;  %v886_v43 = vadd.f32 %v870_v42, %v850_v30  ;;  %v659_v46 = vmul.f32 %v2526_v48, %v2459_v22  ;;  %v835_v15 = vmul.f32 %v2590_v56, %v2564_v57 }
 0x149   : > { %v734_v54 = vadd.f32 %v718_v14, %v698_v27  ;;  %v871_v58 = vmul.f32 %v2597_v60, %v2459_v22  ;;  %v560_v0 = vrot.slane %v2661_v25, 1  ;;  %v570_v4 = vrot.slane %v2664_v2, 1 }
 0x14a   : > { %v585_v3 = vsel %vm577_vm2, %v564_v39, %v574_v32  ;;  %v922_v13 = vadd.f32 %v906_v59, %v886_v43  ;;  %v675_v27 = vadd.f32 %v659_v46, %v2747_v33  ;;  %v862_v14 = vmul.f32 %v2597_v60, %v2658_v29 }
 0x14b   : > { %v770_v61 = vadd.f32 %v754_v5, %v734_v54  ;;  %v695_v42 = vmul.f32 %v2546_v51, %v585_v3  ;;  %v851_v57 = vadd.f32 %v835_v15, %v2757_v34  ;;  %v907_v30 = vmul.f32 %v2623_v7, %v585_v3 }
 0x14c   : > { %v581_v35 = vsel %vm577_vm2, %v560_v0, %v570_v4  ;;  %1441 = vmatmul.mubr.msk.f32.vlgmr.msra.gmra.mrb[0].mxu1 %vm938_vm3, %v922_v13  ;;  %v651_v33 = vmul.f32 %v2526_v48, %v2661_v25  ;;  %v898_v5 = vmul.f32 %v2623_v7, %v2900_v63  ;;  %v827_v34 = vmul.f32 %v2590_v56, %v2714_v26 }
 0x14d   : > { %v806_v16 = vadd.f32 %v790_v11, %v770_v61  ;;  %v2955_v62 = vadd.f32 %v695_v42, %v675_v27  ;;  %v687_v59 = vmul.f32 %v2546_v51, %v581_v35  ;;  %v887_v43 = vadd.f32 %v871_v58, %v851_v57 }
 0x14e   : > { %v863_v54 = vmul.f32 %v2597_v60, %v2661_v25  ;;  %v667_v11 = vadd.f32 %v651_v33, %v2833_v28  ;;  %v899_v15 = vmul.f32 %v2623_v7, %v581_v35  ;;  %v3518_v13 = vrot.slane %v2463_v24, 7 }
 0x14f   : > { %v842_v46 = vadd.f32 %v826_v50, %v806_v16  ;;  %v3519_v61 = vrot.slane %v2459_v22, 7  ;;  %v923_v42 = vadd.f32 %v907_v30, %v887_v43  ;;  %v843_v58 = vadd.f32 %v827_v34, %v2841_v9 }
 0x150   : > { %v595_v26 = vsel %vm577_vm2, %v574_v32, %v564_v39  ;;  %v636_v16 = vmul.f32 %v2523_v47, %v2810_v12  ;;  %v2979_v28 = vadd.f32 %v687_v59, %v667_v11  ;;  %v656_v9 = vmul.f32 %v2526_v48, %v2447_v18 }
 0x151   : > { %v522_v27 = vsel %vm514_vm1, %v3519_v61, %v3518_v13  ;;  %v878_v50 = vadd.f32 %v862_v14, %v842_v46  ;;  %v613_v57 = vsel %vm556_vm4, 0.0, %v595_v26  ;;  %1443 = vmatprep.mubr.msk.f32.mxu1 %vm938_vm3, %v923_v42  ;;  %v879_v33 = vadd.f32 %v863_v54, %v843_v58  ;;  %v3024_v26 = vld [vmem:[%s2381_s3 + $0x70] sm:$0xff] }
 0x152   : > { %v640_v22 = vmul.f32 %v2523_v47, %v522_v27  ;;  %v660_v39 = vmul.f32 %v2526_v48, %v2463_v24  ;;  %v696_v32 = vmul.f32 %v2546_v51, %v613_v57  ;;  %v720_v14 = vmul.f32 %v2549_v52, %v2869_v6 }
 0x153   : > { %v792_v30 = vmul.f32 %v2587_v37, %v2900_v63  ;;  %v914_v59 = vadd.f32 %v898_v5, %v878_v50  ;;  %v801_v43 = vmul.f32 %v2587_v37, %v585_v3  ;;  %v793_v34 = vmul.f32 %v2587_v37, %v581_v35 }
 0x154   : > { %v915_v54 = vadd.f32 %v899_v15, %v879_v33  ;;  %v672_v46 = vadd.f32 %v656_v9, %v636_v16  ;;  %v676_v11 = vadd.f32 %v660_v39, %v640_v22  ;;  %v730_v13 = vmul.f32 %v2549_v52, %v522_v27 }
 0x155   : > { %1429 = vmatmul.mubr.msk.f32.vlgmr.msra.gmra.mrb[0].mxu0 %vm938_vm3, %v914_v59  ;;  %v764_v6 = vmul.f32 %v2584_v36, %v2456_v21  ;;  %v3520_v61 = vrot.slane %v2664_v2, 7  ;;  %v3521_v63 = vrot.slane %v2661_v25, 7  ;;  %v591_v35 = vsel %vm577_vm2, %v570_v4, %v560_v0 }
 0x156   : > { %1431 = vmatprep.mubr.msk.f32.mxu0 %vm938_vm3, %v915_v54  ;;  %v708_v5 = vadd.f32 %v2845_v17, %v672_v46  ;;  %v3010_v15 = vadd.f32 %v696_v32, %v676_v11  ;;  %v605_v42 = vsel %vm556_vm4, 0.0, %v591_v35  ;;  %v3016_v58 = vmul.f32 %v2587_v37, %v613_v57  ;;  %v3027_v17 = vld [vmem:[%s2381_s3 + $0x78] sm:$0xff] }
 0x157   : > { %v518_v3 = vsel %vm514_vm1, %v3521_v63, %v3520_v61  ;;  %v648_v25 = vmul.f32 %v2526_v48, %v2649_v55  ;;  %v652_v0 = vmul.f32 %v2526_v48, %v2664_v2  ;;  %v688_v4 = vmul.f32 %v2546_v51, %v605_v42 }
 0x158   : > { %v632_v21 = vmul.f32 %v2523_v47, %v518_v3  ;;  %v744_v16 = vadd.f32 %v2848_v23, %v708_v5  ;;  %v836_v50 = vmul.f32 %v2590_v56, %v522_v27  ;;  %v872_v47 = vmul.f32 %v2597_v60, %v2463_v24 }
 0x159   : > { %v908_v22 = vmul.f32 %v2623_v7, %v613_v57  ;;  %v664_v55 = vadd.f32 %v648_v25, %v2922_v8  ;;  %v722_v48 = vmul.f32 %v2549_v52, %v518_v3  ;;  %v756_v51 = vmul.f32 %v2584_v36, %v2658_v29 }
 0x15a   : > { %v668_v33 = vadd.f32 %v652_v0, %v632_v21  ;;  %v780_v9 = vadd.f32 %v764_v6, %v744_v16  ;;  %v3039_v39 = vmul.f32 %v2587_v37, %v605_v42  ;;  %v485_v23 = vmax.f32 %v3024_v26, 0.0 }
 0x15b   : > { %v3043_v27 = vmax.f32 %v3027_v17, 0.0  ;;  %v700_v32 = vadd.f32 %v2925_v53, %v664_v55  ;;  %v809_v8 = vadd.f32 %v793_v34, %v2837_v45  ;;  %v829_v59 = vmul.f32 %v2590_v56, %v2499_v38 }
 0x15c   : > { %v3046_v57 = vadd.f32 %v688_v4, %v668_v33  ;;  %v816_v29 = vadd.f32 %v2910_v31, %v780_v9  ;;  %v828_v54 = vmul.f32 %v2590_v56, %v518_v3  ;;  %v502_v46 = vrot.slane %v485_v23, 7 }
 0x15d   : > { %v512_v11 = vrot.slane %v3043_v27, 7  ;;  %v736_v6 = vadd.f32 %v720_v14, %v700_v32  ;;  %v565_v61 = vrot.slane %v485_v23, 1  ;;  %v575_v63 = vrot.slane %v3043_v27, 1 }
 0x15e   : > { %v817_v53 = vadd.f32 %v801_v43, %v2753_v19  ;;  %v852_v35 = vadd.f32 %v836_v50, %v816_v29  ;;  %v845_v34 = vadd.f32 %v829_v59, %v809_v8  ;;  %v865_v5 = vmul.f32 %v2597_v60, %v2424_v10 }
 0x15f   : > { %v533_v45 = vsel %vm514_vm1, %v512_v11, %v502_v46  ;;  %v772_v31 = vadd.f32 %v756_v51, %v736_v6  ;;  %v864_v3 = vmul.f32 %v2597_v60, %v2664_v2  ;;  %v900_v21 = vmul.f32 %v2623_v7, %v605_v42 }
 0x160   : > { %v551_v14 = vsel %vm492_vm0, 0.0, %v533_v45  ;;  %v888_v25 = vadd.f32 %v872_v47, %v852_v35  ;;  %v873_v43 = vmul.f32 %v2597_v60, %v485_v23  ;;  %v901_v0 = vmul.f32 %v2623_v7, %v2535_v49 }
 0x161   : > { %v837_v19 = vmul.f32 %v2590_v56, %v551_v14  ;;  %v808_v4 = vadd.f32 %v792_v30, %v772_v31  ;;  %v586_v16 = vsel %vm577_vm2, %v565_v61, %v575_v63  ;;  %v523_v50 = vsel %vm514_vm1, %v502_v46, %v512_v11  ;;  %v461_v11 = vld [vmem:[%s380_s12] sm:$0xff] }
 0x162   : > { %v596_v42 = vsel %vm577_vm2, %v575_v63, %v565_v61  ;;  %v924_v55 = vadd.f32 %v908_v22, %v888_v25  ;;  %v909_v33 = vmul.f32 %v2623_v7, %v586_v16  ;;  %v881_v51 = vadd.f32 %v865_v5, %v845_v34  ;;  %v3522_v31 = vld [vmem:[#allocation41_spill] sm:$0xff] }
 0x163   : > { %v853_v47 = vadd.f32 %v837_v19, %v817_v53  ;;  %v844_v9 = vadd.f32 %v828_v54, %v808_v4  ;;  %v731_v32 = vmul.f32 %v2549_v52, %v551_v14  ;;  %v746_v30 = vadd.f32 %v730_v13, %v2850_v20 }
 0x164   : > { %v766_v8 = vmul.f32 %v2584_v36, %v2463_v24  ;;  %1444 = vmatmul.mubr.msk.f32.gmra.mrb[2].mxu1 %vm938_vm3, %v924_v55  ;;  %v803_v59 = vmul.f32 %v2587_v37, %v586_v16  ;;  %v615_v22 = vsel %vm556_vm4, 0.0, %v596_v42  ;;  %v732_v46 = vmul.f32 %v2549_v52, %v523_v50  ;;  %v462_v24 = vld [vmem:[%s380_s12 + $0x8] sm:$0xff]  ;;  %s3544_s12 = smov %s3543_s30 }
 0x165   : > { %v889_v29 = vadd.f32 %v873_v43, %v853_v47  ;;  %v880_v54 = vadd.f32 %v864_v3, %v844_v9  ;;  %v838_v61 = vmul.f32 %v2590_v56, %v523_v50  ;;  %v738_v20 = vadd.f32 %v722_v48, %v2930_v41 }
 0x166   : > { %v782_v6 = vadd.f32 %v766_v8, %v746_v30  ;;  %v917_v63 = vadd.f32 %v901_v0, %v881_v51  ;;  %v874_v53 = vmul.f32 %v2597_v60, %v3043_v27  ;;  %v758_v35 = vmul.f32 %v2584_v36, %v2664_v2  ;;  %v3523_v0 = vld [vmem:[#allocation36_spill] sm:$0xff] }
 0x167   : > { %v925_v13 = vadd.f32 %v909_v33, %v889_v29  ;;  %v916_v45 = vadd.f32 %v900_v21, %v880_v54  ;;  %v830_v5 = vmul.f32 %v2590_v56, %v2778_v44  ;;  %v467_v3 = vmul.f32 %v3522_v31, %v461_v11  ;;  %v3524_v33 = vld [vmem:[#allocation48_spill] sm:$0xff] }
 0x168   : > { %v818_v34 = vadd.f32 %v3016_v58, %v782_v6  ;;  %v774_v41 = vadd.f32 %v758_v35, %v738_v20  ;;  %v468_v48 = vmul.f32 %v3522_v31, %v462_v24  ;;  %v747_v14 = vadd.f32 %v731_v32, %v2955_v62 }
 0x169   : > { %1446 = vmatprep.mubr.msk.f32.mxu1 %vm938_vm3, %v925_v13  ;;  %v767_v25 = vmul.f32 %v2584_v36, %v485_v23  ;;  %1432 = vmatmul.mubr.msk.f32.gmra.mrb[2].mxu0 %vm938_vm3, %v916_v45  ;;  %v910_v21 = vmul.f32 %v2623_v7, %v615_v22  ;;  %v487_v58 = vmax.f32 %v467_v3, 0.0  ;;  %v723_v19 = vmul.f32 %v2549_v52, %v2499_v38  ;;  %v3527_v3 = vld [vmem:[#allocation40_spill] sm:$0xff] }
 0x16a   : > { %v854_v2 = vadd.f32 %v838_v61, %v818_v34  ;;  %1434 = vmatprep.mubr.msk.f32.mxu0 %vm938_vm3, %v917_v63  ;;  %v810_v43 = vadd.f32 %v3039_v39, %v774_v41  ;;  %v866_v4 = vmul.f32 %v2597_v60, %v3523_v0  ;;  %v488_v16 = vmax.f32 %v468_v48, 0.0 }
 0x16b   : > { %v783_v62 = vadd.f32 %v767_v25, %v747_v14  ;;  %v503_v23 = vrot.slane %v487_v58, 7  ;;  %v566_v42 = vrot.slane %v487_v58, 1  ;;  %v759_v55 = vmul.f32 %v2584_v36, %v2424_v10 }
 0x16c   : > { %v890_v50 = vadd.f32 %v874_v53, %v854_v2  ;;  %v846_v47 = vadd.f32 %v830_v5, %v810_v43  ;;  %v902_v51 = vmul.f32 %v2623_v7, %v3524_v33  ;;  %v513_v38 = vrot.slane %v488_v16, 7  ;;  %v3526_v53 = vld [vmem:[#allocation37_spill] sm:$0xff] }
 0x16d   : > { %v576_v9 = vrot.slane %v488_v16, 1  ;;  %v804_v32 = vmul.f32 %v2587_v37, %v615_v22  ;;  %v739_v30 = vadd.f32 %v723_v19, %v2979_v28  ;;  %v795_v8 = vmul.f32 %v2587_v37, %v2535_v49  ;;  %v3525_v28 = vld [vmem:[#allocation39_spill] sm:$0xff] }
 0x16e   : > { %v926_v39 = vadd.f32 %v910_v21, %v890_v50  ;;  %v882_v29 = vadd.f32 %v866_v4, %v846_v47  ;;  %v534_v11 = vsel %vm514_vm1, %v513_v38, %v503_v23  ;;  %v819_v54 = vadd.f32 %v803_v59, %v783_v62  ;;  %v3528_v50 = vld [vmem:[#allocation49_spill] sm:$0xff] }
 0x16f   : > { %v875_v10 = vmul.f32 %v2597_v60, %v487_v58  ;;  %v553_v6 = vsel %vm492_vm0, 0.0, %v534_v11  ;;  %v587_v22 = vsel %vm577_vm2, %v566_v42, %v576_v9  ;;  %v775_v61 = vadd.f32 %v759_v55, %v739_v30  ;;  %v3168_v55 = vld [vmem:[%s3529_s8] ss:$0 sm:$0xff] }
 0x170   : > { %1447 = vmatmul.mubr.msk.f32.gmra.mrb[4].mxu1 %vm938_vm3, %v926_v39  ;;  %v831_v20 = vmul.f32 %v2590_v56, %v3525_v28  ;;  %v918_v49 = vadd.f32 %v902_v51, %v882_v29  ;;  %v839_v24 = vmul.f32 %v2590_v56, %v553_v6  ;;  %v524_v59 = vsel %vm514_vm1, %v503_v23, %v513_v38  ;;  %v3530_v51 = vld [vmem:[#allocation32_spill] sm:$0xff]  ;;  %v3531_v38 = vld [vmem:[#allocation31_spill] sm:$0xff] }
 0x171   : > { %v748_v13 = vadd.f32 %v732_v46, %v3010_v15  ;;  %v811_v63 = vadd.f32 %v795_v8, %v775_v61  ;;  %v867_v35 = vmul.f32 %v2597_v60, %v3526_v53  ;;  %v597_v45 = vsel %vm577_vm2, %v576_v9, %v566_v42  ;;  %v3532_v29 = vld [vmem:[#allocation43_spill] sm:$0xff] }
 0x172   : > { %v768_v34 = vmul.f32 %v2584_v36, %v3043_v27  ;;  %1435 = vmatmul.mubr.msk.f32.gmra.mrb[4].mxu0 %vm938_vm3, %v918_v49  ;;  %v855_v5 = vadd.f32 %v839_v24, %v819_v54  ;;  %v911_v31 = vmul.f32 %v2623_v7, %v587_v22  ;;  %v903_v41 = vmul.f32 %v2623_v7, %v3527_v3  ;;  %v3533_v54 = vld [vmem:[#allocation42_spill] sm:$0xff]  ;;  %v3535_v24 = vld [vmem:[#allocation33_spill] sm:$0xff] }
 0x173   : > { %v724_v15 = vmul.f32 %v2549_v52, %v2778_v44  ;;  %v847_v46 = vadd.f32 %v831_v20, %v811_v63  ;;  %v840_v14 = vmul.f32 %v2590_v56, %v524_v59  ;;  %v760_v1 = vmul.f32 %v2584_v36, %v3523_v0  ;;  %v3534_v20 = vld [vmem:[#allocation34_spill] sm:$0xff] }
 0x174   : > { %v784_v48 = vadd.f32 %v768_v34, %v748_v13  ;;  %v891_v25 = vadd.f32 %v875_v10, %v855_v5  ;;  %v617_v27 = vsel %vm556_vm4, 0.0, %v597_v45  ;;  %v796_v21 = vmul.f32 %v2587_v37, %v3524_v33  ;;  %v3536_v45 = vld [vmem:[#allocation45_spill] sm:$0xff]  ;;  %v3537_v5 = vld [vmem:[#allocation44_spill] sm:$0xff] }
 0x175   : > { %v740_v2 = vadd.f32 %v724_v15, %v3046_v57  ;;  %v883_v58 = vadd.f32 %v867_v35, %v847_v46  ;;  %v876_v52 = vmul.f32 %v2597_v60, %v488_v16  ;;  %v832_v4 = vmul.f32 %v2590_v56, %v2810_v12 }
 0x176   : > { %v820_v19 = vadd.f32 %v804_v32, %v784_v48  ;;  %v927_v44 = vadd.f32 %v911_v31, %v891_v25  ;;  %v912_v0 = vmul.f32 %v2623_v7, %v617_v27  ;;  %v868_v57 = vmul.f32 %v2597_v60, %v2447_v18  ;;  %v3539_v48 = vld [vmem:[#allocation38_spill] sm:$0xff]  ;;  %v3540_v27 = vld [vmem:[#allocation35_spill] sm:$0xff] }
 0x177   : > { %v776_v43 = vadd.f32 %v760_v1, %v740_v2  ;;  %v919_v62 = vadd.f32 %v903_v41, %v883_v58  ;;  %v904_v23 = vmul.f32 %v2623_v7, %v3528_v50 }
 0x178   : > { %v856_v36 = vadd.f32 %v840_v14, %v820_v19  ;;  %1449 = vmatprep.mubr.msk.f32.mxu1 %vm938_vm3, %v927_v44  ;;  %v3541_v19 = vld [vmem:[#allocation47_spill] sm:$0xff]  ;;  %v3542_v44 = vld [vmem:[#allocation46_spill] sm:$0xff] }
 0x179   : > { %v812_v40 = vadd.f32 %v796_v21, %v776_v43  ;;  %1437 = vmatprep.mubr.msk.f32.mxu0 %vm938_vm3, %v919_v62 }
 0x17a   : > { %v892_v37 = vadd.f32 %v876_v52, %v856_v36 }
 0x17b   : > { %v848_v16 = vadd.f32 %v832_v4, %v812_v40 }
 0x17c   : > { %v928_v42 = vadd.f32 %v912_v0, %v892_v37 }
 0x17d   : > { %v884_v56 = vadd.f32 %v868_v57, %v848_v16 }
 0x17e   : > { %1450 = vmatmul.mubr.msk.f32.gmra.mrb[6].mxu1 %vm938_vm3, %v928_v42  ;;  %v1621_v42 = vld [vmem:[%s2381_s3 + $0x38] sm:$0xff] }
 0x17f   : > { %v920_v12 = vadd.f32 %v904_v23, %v884_v56 }
 0x181   : > { %1438 = vmatmul.mubr.msk.f32.gmra.mrb[6].mxu0 %vm938_vm3, %v920_v12 }
 0x21f   : > { %v1442_v18 = vpop.f32.mrb[0].mxu1 }
 0x220   : > { %v1099_v60 = vadd.f32 %v1442_v18, %v3168_v55  ;;  %v1093_v47 = vpop.f32.mrb[1].mxu1 }
 0x221   : > { %v1094_v33 = vadd.f32 %v3168_v55, %v1093_v47 }
 0x222   : > { %v1141_v7 = vadd.f32 %v1099_v60, %v3530_v51 }
 0x223   : > { %v1140_v9 = vadd.f32 %v1094_v33, %v3531_v38 }
 0x224   : > { %1157 = vst.msk [vmem:[%s3176_s9 + $0x48] sm:$0xff] %vm938_vm3, %v1141_v7 }
 0x225   : > { %1156 = vst.msk [vmem:[%s3176_s9 + $0x40] sm:$0xff] %vm938_vm3, %v1140_v9 }
 0x228   : > { %v1430_v32 = vpop.f32.mrb[0].mxu0 }
 0x229   : > { %v1059_v39 = vadd.f32 %v1430_v32, %v3168_v55  ;;  %v1053_v30 = vpop.f32.mrb[1].mxu0 }
 0x22a   : > { %v1054_v8 = vadd.f32 %v3168_v55, %v1053_v30 }
 0x22b   : > { %v1133_v11 = vadd.f32 %v1059_v39, %v3532_v29 }
 0x22c   : > { %v1132_v10 = vadd.f32 %v1054_v8, %v3533_v54 }
 0x22d   : > { %1149 = vst.msk [vmem:[%s3176_s9 + $0x8] sm:$0xff] %vm938_vm3, %v1133_v11 }
 0x22e   : > { %1148 = vst.msk [vmem:[%s3176_s9] sm:$0xff] %vm938_vm3, %v1132_v10 }
 0x237   : > { %v1445_v6 = vpop.f32.mrb[2].mxu1 }
 0x238   : > { %v1109_v22 = vadd.f32 %v1445_v6, %v3168_v55  ;;  %v1103_v61 = vpop.f32.mrb[3].mxu1 }
 0x239   : > { %v1104_v28 = vadd.f32 %v3168_v55, %v1103_v61 }
 0x23a   : > { %v1143_v49 = vadd.f32 %v1109_v22, %v3534_v20 }
 0x23b   : > { %v1142_v59 = vadd.f32 %v1104_v28, %v3535_v24 }
 0x23c   : > { %1159 = vst.msk [vmem:[%s3176_s9 + $0x58] sm:$0xff] %vm938_vm3, %v1143_v49  ;;  %v1433_v13 = vpop.f32.mrb[2].mxu0 }
 0x23d   : > { %v1069_v63 = vadd.f32 %v1433_v13, %v3168_v55  ;;  %1158 = vst.msk [vmem:[%s3176_s9 + $0x50] sm:$0xff] %vm938_vm3, %v1142_v59  ;;  %v1063_v53 = vpop.f32.mrb[3].mxu0 }
 0x23e   : > { %v1064_v35 = vadd.f32 %v3168_v55, %v1063_v53 }
 0x23f   : > { %v1135_v34 = vadd.f32 %v1069_v63, %v3536_v45 }
 0x240   : > { %v1134_v31 = vadd.f32 %v1064_v35, %v3537_v5 }
 0x241   : > { %1151 = vst.msk [vmem:[%s3176_s9 + $0x18] sm:$0xff] %vm938_vm3, %v1135_v34 }
 0x242   : > { %1150 = vst.msk [vmem:[%s3176_s9 + $0x10] sm:$0xff] %vm938_vm3, %v1134_v31 }
 0x243   : > { %v1448_v3 = vpop.f32.mrb[4].mxu1 }
 0x244   : > { %v1119_v41 = vadd.f32 %v1448_v3, %v3168_v55  ;;  %v1113_v15 = vpop.f32.mrb[5].mxu1 }
 0x245   : > { %v1114_v46 = vadd.f32 %v3168_v55, %v1113_v15  ;;  %v1436_v1 = vpop.f32.mrb[4].mxu0 }
 0x246   : > { %v1145_v14 = vadd.f32 %v1119_v41, %v3539_v48  ;;  %v1079_v25 = vadd.f32 %v1436_v1, %v3168_v55  ;;  %v1073_v21 = vpop.f32.mrb[5].mxu0 }
 0x247   : > { %v1144_v2 = vadd.f32 %v1114_v46, %v3540_v27  ;;  %v1074_v58 = vadd.f32 %v3168_v55, %v1073_v21 }
 0x248   : > { %1161 = vst.msk [vmem:[%s3176_s9 + $0x68] sm:$0xff] %vm938_vm3, %v1145_v14  ;;  %v1137_v52 = vadd.f32 %v1079_v25, %v3541_v19 }
 0x249   : > { %1160 = vst.msk [vmem:[%s3176_s9 + $0x60] sm:$0xff] %vm938_vm3, %v1144_v2  ;;  %v1136_v43 = vadd.f32 %v1074_v58, %v3542_v44 }
 0x24a   : > { %1153 = vst.msk [vmem:[%s3176_s9 + $0x28] sm:$0xff] %vm938_vm3, %v1137_v52 }
 0x24b   : > { %1152 = vst.msk [vmem:[%s3176_s9 + $0x20] sm:$0xff] %vm938_vm3, %v1136_v43 }
 0x251   : > { %v1451_v4 = vpop.f32.mrb[6].mxu1 }
 0x252   : > { %v1129_v62 = vadd.f32 %v1451_v4, %v3168_v55  ;;  %v1123_v36 = vpop.f32.mrb[7].mxu1 }
 0x253   : > { %v1124_v0 = vadd.f32 %v3168_v55, %v1123_v36 }
 0x254   : > { %v1147_v40 = vadd.f32 %v1129_v62, %v3027_v17  ;;  %v1439_v57 = vpop.f32.mrb[6].mxu0 }
 0x255   : > { %v1089_v37 = vadd.f32 %v1439_v57, %v3168_v55  ;;  %v1146_v16 = vadd.f32 %v1124_v0, %v3024_v26  ;;  %v1083_v50 = vpop.f32.mrb[7].mxu0  ;;  %v1622_v26 = vld [vmem:[%s2381_s3 + $0x30] sm:$0xff] }
 0x256   : > { %1163 = vst.msk [vmem:[%s3176_s9 + $0x78] sm:$0xff] %vm938_vm3, %v1147_v40  ;;  %v1084_v23 = vadd.f32 %v3168_v55, %v1083_v50 }
 0x257   : > { %v1139_v56 = vadd.f32 %v1621_v42, %v1089_v37  ;;  %1162 = vst.msk [vmem:[%s3176_s9 + $0x70] sm:$0xff] %vm938_vm3, %v1146_v16 }
 0x258   : > { %v1138_v17 = vadd.f32 %v1622_v26, %v1084_v23 }
 0x259   : > { %1155 = vst.msk [vmem:[%s3176_s9 + $0x38] sm:$0xff] %vm938_vm3, %v1139_v56 }
 0x25a   : > { %1154 = vst.msk [vmem:[%s3176_s9 + $0x30] sm:$0xff] %vm938_vm3, %v1138_v17 }
 0x25b   : > { %1782 = shalt.err (!%p1779_p9)
}
 0x25c   : > { %s1783_s3 = scalar_lea.hbm %s3239_s14, 2048  ;;  %s1787_s9 = scalar_lea.hbm %s3544_s12, 8192 }
 0x25d   : > { %p1784_p11 = scmp.ne.s32.totalorder %s3239_s14, %s1783_s3  ;;  %p1788_p4 = scmp.lt.u32.totalorder %s3239_s14, %s3544_s12 }
 0x25e   : > { %p1789_p10 = scmp.lt.u32.totalorder %s1787_s9, %s1783_s3  ;;  %p1791_p8 = scmp.lt.u32.totalorder %s1783_s3, %s3239_s14 }
 0x25f   : > { %p1785_p3 = pnand %p1784_p11, %p3545_p0 }
 0x260   : > { %p1790_p12 = por %p1789_p10, %p1788_p4 }
 0x261   : > { %p1786_p7 = pneg %p1785_p3 }
 0x262   : > { %p1792_p13 = por %p1791_p8, %p1790_p12 }
 0x264   : > { %p1793_p1 = pnand %p1792_p13, %p1786_p7 }
 0x266   : > { %1796 = shalt.err (!%p1793_p1)
}
 0x267   : > { %s1939_s23 = smov 128   ;;  %s1940_s13 = smov 8  }
 0x268   : > { %1472 = dma.vmem_to_hbm [thread:$0]  (%p3545_p0), %s3241_s15, 2048, %s3239_s14, %s1165_s11, %s1939_s23, %s1939_s23, %s1940_s13  }
 0x269 PF: > { %p1500_p2 = scmp.ge.s32.totalorder %s1927_s10, 2  ;;  %s1196_s1 = sand.u32 1, %s1899_s27  }
 0x26a   : > { %p3546_p5 = scmp.ne.s32.totalorder %s3441_s6, 0  ;;  %s1197_s0 = scalar_lea.sflag [#allocation4], %s1196_s1 }
 0x26c   : > { %p1492_p6 = pnand %p1500_p2, %p3546_p5 }
 0x26e   : > { %1870 = dma.done.wait (!%p1492_p6), %s1197_s0, 2048  }
 0x26f   : > { %1872 = vsyncadd (!%p1492_p6), %s1197_s0, 4294965248  ;;  %s26_s10 = sadd.s32 1, %s1927_s10   ;;  %s3548_s21 = sld [smem:[#allocation18_spill]] }
 0x270   : > { %p3277_p9 = scmp.ge.s32.totalorder %s26_s10, 6   ;;  %s3549_s22 = sld [smem:[#allocation19_spill]] }
 0x271   : > { %s3550_s24 = sld [smem:[#allocation20_spill]]  ;;  %s3551_s16 = sld [smem:[#allocation30_spill]] }
 0x272   : > { %s3552_s30 = sld [smem:[#allocation23_spill]]  ;;  %s3553_s7 = sld [smem:[#allocation24_spill]] }
 0x273   : > { %s3554_s8 = sld [smem:[#allocation26_spill]]  ;;  %s3555_s9 = sld [smem:[#allocation27_spill]] }
 0x274   : > { %s3557_s23 = smov %s3578_s5  ;;  %s3558_s25 = smov %s1895_s26 }
 0x275   : > { %s3559_s26 = smov %s2132_s2  ;;  %s3560_s27 = smov %s1903_s28 }
 0x276   : > { %s3561_s28 = smov %s1907_s29  ;;  %25 = sbr.rel (!%p3277_p9) target bundleno = 21 (0x15), region = 121 }
 0x277   : > { %s3562_s29 = smov %s3551_s16 }
 0x27d   :  { %1202 = vsyncpa [#allocation3], 1 }
 0x27e   :  { %1204 = vsyncpa [#allocation3 + $0x1], 1 }
 0x27f   :  { %1205 = vsyncpa [#allocation6], 1 }
 0x280   :  { %1207 = vsyncpa [#allocation6 + $0x1], 1 }
 0x281   :  { %1208 = vsyncpa [#allocation9], 1 }
 0x282   :  { %1209 = vsyncpa [#allocation4], 1 }
 0x283   :  { %1211 = vsyncpa [#allocation4 + $0x1], 1 }

</bundles_post_ra>
